<compile_context>
chip_gen: v6e
topology: v6e:2x2x1
jax: 0.10.0
libtpu: 0.0.40
codegen_flags: <defaults>
</compile_context>

<pallas_src>
import jax
import jax.numpy as jnp
from jax import lax
from jax.experimental import pallas as pl
from jax.experimental.pallas import tpu as pltpu


def lstm_decoder_kernel(x_ref, h0_ref, c0_ref, wih_ref, whh_ref, b_ref,
                        wlin_ref, blin_ref,
                        pred_ref, hn_ref, cn_ref,
                        hs_scratch):
    T = x_ref.shape[0]
    HP = h0_ref.shape[1]          # lane-padded hidden size (multiple of 128)
    O = pred_ref.shape[1]

    # ---- Non-recurrent work hoisted off the critical path -------------------
    # One (T, I) x (I, 4*HP) matmul replaces T separate M=1 matmuls; bias is
    # folded in here as well.
    xg = (jnp.dot(x_ref[...], wih_ref[...],
                  preferred_element_type=jnp.float32)
          + b_ref[...])                                      # (T, 4*HP)

    # Loop-invariant load hoisted (JAX does not CSE repeated ref reads).
    whh = whh_ref[...]                                       # (HP, 4*HP)

    h = h0_ref[...]                                          # (1, HP)
    c = c0_ref[...]                                          # (1, HP)

    # ---- Fully unrolled recurrence (T static) --------------------------------
    # Only the (1, HP) x (HP, 4*HP) recurrent matmul + gate nonlinearities are
    # sequential. Gate slices are 128-lane aligned thanks to host-side padding.
    for t in range(T):
        gates = xg[t:t + 1, :] + jnp.dot(h, whh,
                                         preferred_element_type=jnp.float32)
        i_g = jax.nn.sigmoid(gates[:, 0 * HP:1 * HP])
        f_g = jax.nn.sigmoid(gates[:, 1 * HP:2 * HP])
        g_g = jnp.tanh(gates[:, 2 * HP:3 * HP])
        o_g = jax.nn.sigmoid(gates[:, 3 * HP:4 * HP])
        c = f_g * c + i_g * g_g
        h = o_g * jnp.tanh(c)
        hs_scratch[t:t + 1, :] = h                           # static-index store

    hn_ref[...] = h
    cn_ref[...] = c

    # ---- Linear head ---------------------------------------------------------
    hs = hs_scratch[...]                                     # (T, HP)
    if O == 1:
        # N=1 matmul wastes the MXU; VPU multiply + lane reduce instead.
        # wlin_ref is the single linear row, (1, HP), padded rows are zero.
        pred_ref[...] = (jnp.sum(hs * wlin_ref[...], axis=-1, keepdims=True)
                         + blin_ref[...])
    else:
        pred_ref[...] = (jnp.dot(hs, wlin_ref[...],
                                 preferred_element_type=jnp.float32)
                         + blin_ref[...])


def lstm_decoder_forward(x, h0, c0, w_ih, w_hh, b_ih, b_hh, w_lin, b_lin):
    """x: (T, input_size); h0/c0: (1, hidden); PyTorch-shaped weights."""
    T, I = x.shape
    H = w_hh.shape[1]
    O = w_lin.shape[0]

    LANE = 128
    HP = ((H + LANE - 1) // LANE) * LANE      # lane-padded hidden size

    # Pad each of the 4 gate blocks along the 4H axis from H -> HP so in-kernel
    # gate slices land on 128-lane boundaries. Padded weights/bias are zero, so
    # padded gate pre-activations are 0; with zero-padded h0/c0 the padded
    # lanes of h and c stay exactly 0 through the recurrence.
    def pad_gate_cols(w_t):                    # (rows, 4H) -> (rows, 4*HP)
        rows = w_t.shape[0]
        blocks = w_t.reshape(rows, 4, H)
        blocks = jnp.pad(blocks, ((0, 0), (0, 0), (0, HP - H)))
        return blocks.reshape(rows, 4 * HP)

    wih_t = pad_gate_cols(jnp.transpose(w_ih))                    # (I,  4*HP)
    whh_t = jnp.pad(pad_gate_cols(jnp.transpose(w_hh)),
                    ((0, HP - H), (0, 0)))                        # (HP, 4*HP)
    b = pad_gate_cols((b_ih + b_hh).reshape(1, 4 * H))            # (1,  4*HP)

    h0_p = jnp.pad(h0.reshape(1, H), ((0, 0), (0, HP - H)))       # (1, HP)
    c0_p = jnp.pad(c0.reshape(1, H), ((0, 0), (0, HP - H)))       # (1, HP)

    if O == 1:
        wlin = jnp.pad(w_lin.reshape(1, H), ((0, 0), (0, HP - H)))   # (1, HP)
    else:
        wlin = jnp.pad(jnp.transpose(w_lin), ((0, HP - H), (0, 0)))  # (HP, O)
    blin = b_lin.reshape(1, O)

    vmem = lambda: pl.BlockSpec(memory_space=pltpu.MemorySpace.VMEM)

    pred, h_n, c_n = pl.pallas_call(
        lstm_decoder_kernel,
        out_shape=(
            jax.ShapeDtypeStruct((T, O), jnp.float32),
            jax.ShapeDtypeStruct((1, HP), jnp.float32),
            jax.ShapeDtypeStruct((1, HP), jnp.float32),
        ),
        in_specs=[vmem() for _ in range(8)],
        out_specs=(vmem(), vmem(), vmem()),
        scratch_shapes=[pltpu.VMEM((T, HP), jnp.float32)],
    )(x, h0_p, c0_p, wih_t, whh_t, b, wlin, blin)

    # Strip lane padding from the returned hidden/cell state.
    return pred, (h_n[:, :H], c_n[:, :H])


def _reference(x, h0, c0, w_ih, w_hh, b_ih, b_hh, w_lin, b_lin):
    """Pure-JAX reference matching torch.nn.LSTM (unbatched) + nn.Linear."""
    H = w_hh.shape[1]

    def step(carry, x_t):
        h, c = carry
        gates = x_t @ w_ih.T + b_ih + h @ w_hh.T + b_hh
        i = jax.nn.sigmoid(gates[0:H])
        f = jax.nn.sigmoid(gates[H:2 * H])
        g = jnp.tanh(gates[2 * H:3 * H])
        o = jax.nn.sigmoid(gates[3 * H:4 * H])
        c_new = f * c + i * g
        h_new = o * jnp.tanh(c_new)
        return (h_new, c_new), h_new

    (h_f, c_f), hs = lax.scan(step, (h0[0], c0[0]), x)
    pred = hs @ w_lin.T + b_lin
    return pred, (h_f[None], c_f[None])


if __name__ == "__main__":
    input_size, hidden_size, output_size, num_layers = 32, 64, 1, 1
    T = 8  # "batch_size" axis of the 2D x_input (PyTorch treats it as seq_len)

    key = jax.random.PRNGKey(0)
    ks = jax.random.split(key, 9)
    bound = 1.0 / jnp.sqrt(hidden_size)

    x = jax.random.normal(ks[0], (T, input_size), jnp.float32)
    h0 = jax.random.normal(ks[1], (num_layers, hidden_size), jnp.float32)
    c0 = jax.random.normal(ks[2], (num_layers, hidden_size), jnp.float32)

    # nn.LSTM parameters (PyTorch default uniform init, deterministic here).
    u = lambda k, shape: jax.random.uniform(k, shape, jnp.float32, -bound, bound)
    w_ih = u(ks[3], (4 * hidden_size, input_size))
    w_hh = u(ks[4], (4 * hidden_size, hidden_size))
    b_ih = u(ks[5], (4 * hidden_size,))
    b_hh = u(ks[6], (4 * hidden_size,))
    # nn.Linear parameters.
    w_lin = u(ks[7], (output_size, hidden_size))
    b_lin = u(ks[8], (output_size,))

    pred, (h_n, c_n) = lstm_decoder_forward(
        x, h0, c0, w_ih, w_hh, b_ih, b_hh, w_lin, b_lin)
    jax.block_until_ready((pred, h_n, c_n))

    pred_ref, (h_ref, c_ref) = _reference(
        x, h0, c0, w_ih, w_hh, b_ih, b_hh, w_lin, b_lin)
    assert pred.shape == (T, output_size)
    assert h_n.shape == (num_layers, hidden_size)
    assert c_n.shape == (num_layers, hidden_size)
    assert jnp.allclose(pred, pred_ref, atol=1e-5, rtol=1e-5)
    assert jnp.allclose(h_n, h_ref, atol=1e-5, rtol=1e-5)
    assert jnp.allclose(c_n, c_ref, atol=1e-5, rtol=1e-5)

    print("KERNEL_OK")
</pallas_src>

<mosaic_0001>
module attributes {stable_mosaic.version = 11 : i64} {
  func.func @lstm_decoder_kernel(%arg0: memref<8x32xf32, #tpu.memory_space<vmem>>, %arg1: memref<1x128xf32, #tpu.memory_space<vmem>>, %arg2: memref<1x128xf32, #tpu.memory_space<vmem>>, %arg3: memref<32x512xf32, #tpu.memory_space<vmem>>, %arg4: memref<128x512xf32, #tpu.memory_space<vmem>>, %arg5: memref<1x512xf32, #tpu.memory_space<vmem>>, %arg6: memref<1x128xf32, #tpu.memory_space<vmem>>, %arg7: memref<1x1xf32, #tpu.memory_space<vmem>>, %arg8: memref<8x1xf32, #tpu.memory_space<vmem>>, %arg9: memref<1x128xf32, #tpu.memory_space<vmem>>, %arg10: memref<1x128xf32, #tpu.memory_space<vmem>>, %arg11: memref<8x128xf32, #tpu.memory_space<vmem>>) attributes {dimension_semantics = [], scalar_prefetch = 0 : i64, scratch_operands = 1 : i64, tpu.core_type = #tpu.core_type<tc>} {
    %c0 = arith.constant 0 : index
    %c0_0 = arith.constant 0 : index
    %0 = vector.load %arg0[%c0, %c0_0] : memref<8x32xf32, #tpu.memory_space<vmem>>, vector<8x32xf32>
    %c0_1 = arith.constant 0 : index
    %c0_2 = arith.constant 0 : index
    %1 = vector.load %arg3[%c0_1, %c0_2] : memref<32x512xf32, #tpu.memory_space<vmem>>, vector<32x512xf32>
    %cst = arith.constant dense<0.000000e+00> : vector<8x512xf32>
    %2 = tpu.matmul %0, %1, %cst {dimension_numbers = #tpu.dot_dimension_numbers<[1], [0], [0], [1], [0, 0, 1, 1], [], []>} : vector<8x32xf32>, vector<32x512xf32>, vector<8x512xf32> -> vector<8x512xf32>
    %c0_3 = arith.constant 0 : index
    %c0_4 = arith.constant 0 : index
    %3 = vector.load %arg5[%c0_3, %c0_4] : memref<1x512xf32, #tpu.memory_space<vmem>>, vector<1x512xf32>
    %4 = vector.broadcast %3 : vector<1x512xf32> to vector<8x512xf32>
    %5 = arith.addf %2, %4 : vector<8x512xf32>
    %c0_5 = arith.constant 0 : index
    %c0_6 = arith.constant 0 : index
    %6 = vector.load %arg4[%c0_5, %c0_6] : memref<128x512xf32, #tpu.memory_space<vmem>>, vector<128x512xf32>
    %c0_7 = arith.constant 0 : index
    %c0_8 = arith.constant 0 : index
    %7 = vector.load %arg1[%c0_7, %c0_8] : memref<1x128xf32, #tpu.memory_space<vmem>>, vector<1x128xf32>
    %c0_9 = arith.constant 0 : index
    %c0_10 = arith.constant 0 : index
    %8 = vector.load %arg2[%c0_9, %c0_10] : memref<1x128xf32, #tpu.memory_space<vmem>>, vector<1x128xf32>
    %9 = vector.extract_strided_slice %5 {offsets = [0, 0], sizes = [1, 512], strides = [1, 1]} : vector<8x512xf32> to vector<1x512xf32>
    %cst_11 = arith.constant dense<0.000000e+00> : vector<1x512xf32>
    %10 = tpu.matmul %7, %6, %cst_11 {dimension_numbers = #tpu.dot_dimension_numbers<[1], [0], [0], [1], [0, 0, 1, 1], [], []>} : vector<1x128xf32>, vector<128x512xf32>, vector<1x512xf32> -> vector<1x512xf32>
    %11 = arith.addf %9, %10 : vector<1x512xf32>
    %12 = vector.extract_strided_slice %11 {offsets = [0, 0], sizes = [1, 128], strides = [1, 1]} : vector<1x512xf32> to vector<1x128xf32>
    %13 = arith.negf %12 : vector<1x128xf32>
    %14 = math.exp %13 : vector<1x128xf32>
    %cst_12 = arith.constant 1.000000e+00 : f32
    %15 = vector.broadcast %cst_12 : f32 to vector<1x128xf32>
    %16 = arith.addf %15, %14 : vector<1x128xf32>
    %17 = arith.divf %15, %16 : vector<1x128xf32>
    %18 = vector.extract_strided_slice %11 {offsets = [0, 128], sizes = [1, 128], strides = [1, 1]} : vector<1x512xf32> to vector<1x128xf32>
    %19 = arith.negf %18 : vector<1x128xf32>
    %20 = math.exp %19 : vector<1x128xf32>
    %cst_13 = arith.constant 1.000000e+00 : f32
    %21 = vector.broadcast %cst_13 : f32 to vector<1x128xf32>
    %22 = arith.addf %21, %20 : vector<1x128xf32>
    %23 = arith.divf %21, %22 : vector<1x128xf32>
    %24 = vector.extract_strided_slice %11 {offsets = [0, 256], sizes = [1, 128], strides = [1, 1]} : vector<1x512xf32> to vector<1x128xf32>
    %25 = math.tanh %24 : vector<1x128xf32>
    %26 = vector.extract_strided_slice %11 {offsets = [0, 384], sizes = [1, 128], strides = [1, 1]} : vector<1x512xf32> to vector<1x128xf32>
    %27 = arith.negf %26 : vector<1x128xf32>
    %28 = math.exp %27 : vector<1x128xf32>
    %cst_14 = arith.constant 1.000000e+00 : f32
    %29 = vector.broadcast %cst_14 : f32 to vector<1x128xf32>
    %30 = arith.addf %29, %28 : vector<1x128xf32>
    %31 = arith.divf %29, %30 : vector<1x128xf32>
    %32 = arith.mulf %23, %8 : vector<1x128xf32>
    %33 = arith.mulf %17, %25 : vector<1x128xf32>
    %34 = arith.addf %32, %33 : vector<1x128xf32>
    %35 = math.tanh %34 : vector<1x128xf32>
    %36 = arith.mulf %31, %35 : vector<1x128xf32>
    %c0_15 = arith.constant 0 : index
    %c0_16 = arith.constant 0 : index
    %37 = vector.load %arg11[%c0_15, %c0_16] : memref<8x128xf32, #tpu.memory_space<vmem>>, vector<1x128xf32>
    tpu.vector_store %arg11[%c0_15, %c0_16], %36 {strides = array<i32>} : memref<8x128xf32, #tpu.memory_space<vmem>>, vector<1x128xf32>,
    %38 = vector.extract_strided_slice %5 {offsets = [1, 0], sizes = [1, 512], strides = [1, 1]} : vector<8x512xf32> to vector<1x512xf32>
    %cst_17 = arith.constant dense<0.000000e+00> : vector<1x512xf32>
    %39 = tpu.matmul %36, %6, %cst_17 {dimension_numbers = #tpu.dot_dimension_numbers<[1], [0], [0], [1], [0, 0, 1, 1], [], []>} : vector<1x128xf32>, vector<128x512xf32>, vector<1x512xf32> -> vector<1x512xf32>
    %40 = arith.addf %38, %39 : vector<1x512xf32>
    %41 = vector.extract_strided_slice %40 {offsets = [0, 0], sizes = [1, 128], strides = [1, 1]} : vector<1x512xf32> to vector<1x128xf32>
    %42 = arith.negf %41 : vector<1x128xf32>
    %43 = math.exp %42 : vector<1x128xf32>
    %cst_18 = arith.constant 1.000000e+00 : f32
    %44 = vector.broadcast %cst_18 : f32 to vector<1x128xf32>
    %45 = arith.addf %44, %43 : vector<1x128xf32>
    %46 = arith.divf %44, %45 : vector<1x128xf32>
    %47 = vector.extract_strided_slice %40 {offsets = [0, 128], sizes = [1, 128], strides = [1, 1]} : vector<1x512xf32> to vector<1x128xf32>
    %48 = arith.negf %47 : vector<1x128xf32>
    %49 = math.exp %48 : vector<1x128xf32>
    %cst_19 = arith.constant 1.000000e+00 : f32
    %50 = vector.broadcast %cst_19 : f32 to vector<1x128xf32>
    %51 = arith.addf %50, %49 : vector<1x128xf32>
    %52 = arith.divf %50, %51 : vector<1x128xf32>
    %53 = vector.extract_strided_slice %40 {offsets = [0, 256], sizes = [1, 128], strides = [1, 1]} : vector<1x512xf32> to vector<1x128xf32>
    %54 = math.tanh %53 : vector<1x128xf32>
    %55 = vector.extract_strided_slice %40 {offsets = [0, 384], sizes = [1, 128], strides = [1, 1]} : vector<1x512xf32> to vector<1x128xf32>
    %56 = arith.negf %55 : vector<1x128xf32>
    %57 = math.exp %56 : vector<1x128xf32>
    %cst_20 = arith.constant 1.000000e+00 : f32
    %58 = vector.broadcast %cst_20 : f32 to vector<1x128xf32>
    %59 = arith.addf %58, %57 : vector<1x128xf32>
    %60 = arith.divf %58, %59 : vector<1x128xf32>
    %61 = arith.mulf %52, %34 : vector<1x128xf32>
    %62 = arith.mulf %46, %54 : vector<1x128xf32>
    %63 = arith.addf %61, %62 : vector<1x128xf32>
    %64 = math.tanh %63 : vector<1x128xf32>
    %65 = arith.mulf %60, %64 : vector<1x128xf32>
    %c1 = arith.constant 1 : index
    %c0_21 = arith.constant 0 : index
    %66 = vector.load %arg11[%c1, %c0_21] : memref<8x128xf32, #tpu.memory_space<vmem>>, vector<1x128xf32>
    tpu.vector_store %arg11[%c1, %c0_21], %65 {strides = array<i32>} : memref<8x128xf32, #tpu.memory_space<vmem>>, vector<1x128xf32>,
    %67 = vector.extract_strided_slice %5 {offsets = [2, 0], sizes = [1, 512], strides = [1, 1]} : vector<8x512xf32> to vector<1x512xf32>
    %cst_22 = arith.constant dense<0.000000e+00> : vector<1x512xf32>
    %68 = tpu.matmul %65, %6, %cst_22 {dimension_numbers = #tpu.dot_dimension_numbers<[1], [0], [0], [1], [0, 0, 1, 1], [], []>} : vector<1x128xf32>, vector<128x512xf32>, vector<1x512xf32> -> vector<1x512xf32>
    %69 = arith.addf %67, %68 : vector<1x512xf32>
    %70 = vector.extract_strided_slice %69 {offsets = [0, 0], sizes = [1, 128], strides = [1, 1]} : vector<1x512xf32> to vector<1x128xf32>
    %71 = arith.negf %70 : vector<1x128xf32>
    %72 = math.exp %71 : vector<1x128xf32>
    %cst_23 = arith.constant 1.000000e+00 : f32
    %73 = vector.broadcast %cst_23 : f32 to vector<1x128xf32>
    %74 = arith.addf %73, %72 : vector<1x128xf32>
    %75 = arith.divf %73, %74 : vector<1x128xf32>
    %76 = vector.extract_strided_slice %69 {offsets = [0, 128], sizes = [1, 128], strides = [1, 1]} : vector<1x512xf32> to vector<1x128xf32>
    %77 = arith.negf %76 : vector<1x128xf32>
    %78 = math.exp %77 : vector<1x128xf32>
    %cst_24 = arith.constant 1.000000e+00 : f32
    %79 = vector.broadcast %cst_24 : f32 to vector<1x128xf32>
    %80 = arith.addf %79, %78 : vector<1x128xf32>
    %81 = arith.divf %79, %80 : vector<1x128xf32>
    %82 = vector.extract_strided_slice %69 {offsets = [0, 256], sizes = [1, 128], strides = [1, 1]} : vector<1x512xf32> to vector<1x128xf32>
    %83 = math.tanh %82 : vector<1x128xf32>
    %84 = vector.extract_strided_slice %69 {offsets = [0, 384], sizes = [1, 128], strides = [1, 1]} : vector<1x512xf32> to vector<1x128xf32>
    %85 = arith.negf %84 : vector<1x128xf32>
    %86 = math.exp %85 : vector<1x128xf32>
    %cst_25 = arith.constant 1.000000e+00 : f32
    %87 = vector.broadcast %cst_25 : f32 to vector<1x128xf32>
    %88 = arith.addf %87, %86 : vector<1x128xf32>
    %89 = arith.divf %87, %88 : vector<1x128xf32>
    %90 = arith.mulf %81, %63 : vector<1x128xf32>
    %91 = arith.mulf %75, %83 : vector<1x128xf32>
    %92 = arith.addf %90, %91 : vector<1x128xf32>
    %93 = math.tanh %92 : vector<1x128xf32>
    %94 = arith.mulf %89, %93 : vector<1x128xf32>
    %c2 = arith.constant 2 : index
    %c0_26 = arith.constant 0 : index
    %95 = vector.load %arg11[%c2, %c0_26] : memref<8x128xf32, #tpu.memory_space<vmem>>, vector<1x128xf32>
    tpu.vector_store %arg11[%c2, %c0_26], %94 {strides = array<i32>} : memref<8x128xf32, #tpu.memory_space<vmem>>, vector<1x128xf32>,
    %96 = vector.extract_strided_slice %5 {offsets = [3, 0], sizes = [1, 512], strides = [1, 1]} : vector<8x512xf32> to vector<1x512xf32>
    %cst_27 = arith.constant dense<0.000000e+00> : vector<1x512xf32>
    %97 = tpu.matmul %94, %6, %cst_27 {dimension_numbers = #tpu.dot_dimension_numbers<[1], [0], [0], [1], [0, 0, 1, 1], [], []>} : vector<1x128xf32>, vector<128x512xf32>, vector<1x512xf32> -> vector<1x512xf32>
    %98 = arith.addf %96, %97 : vector<1x512xf32>
    %99 = vector.extract_strided_slice %98 {offsets = [0, 0], sizes = [1, 128], strides = [1, 1]} : vector<1x512xf32> to vector<1x128xf32>
    %100 = arith.negf %99 : vector<1x128xf32>
    %101 = math.exp %100 : vector<1x128xf32>
    %cst_28 = arith.constant 1.000000e+00 : f32
    %102 = vector.broadcast %cst_28 : f32 to vector<1x128xf32>
    %103 = arith.addf %102, %101 : vector<1x128xf32>
    %104 = arith.divf %102, %103 : vector<1x128xf32>
    %105 = vector.extract_strided_slice %98 {offsets = [0, 128], sizes = [1, 128], strides = [1, 1]} : vector<1x512xf32> to vector<1x128xf32>
    %106 = arith.negf %105 : vector<1x128xf32>
    %107 = math.exp %106 : vector<1x128xf32>
    %cst_29 = arith.constant 1.000000e+00 : f32
    %108 = vector.broadcast %cst_29 : f32 to vector<1x128xf32>
    %109 = arith.addf %108, %107 : vector<1x128xf32>
    %110 = arith.divf %108, %109 : vector<1x128xf32>
    %111 = vector.extract_strided_slice %98 {offsets = [0, 256], sizes = [1, 128], strides = [1, 1]} : vector<1x512xf32> to vector<1x128xf32>
    %112 = math.tanh %111 : vector<1x128xf32>
    %113 = vector.extract_strided_slice %98 {offsets = [0, 384], sizes = [1, 128], strides = [1, 1]} : vector<1x512xf32> to vector<1x128xf32>
    %114 = arith.negf %113 : vector<1x128xf32>
    %115 = math.exp %114 : vector<1x128xf32>
    %cst_30 = arith.constant 1.000000e+00 : f32
    %116 = vector.broadcast %cst_30 : f32 to vector<1x128xf32>
    %117 = arith.addf %116, %115 : vector<1x128xf32>
    %118 = arith.divf %116, %117 : vector<1x128xf32>
    %119 = arith.mulf %110, %92 : vector<1x128xf32>
    %120 = arith.mulf %104, %112 : vector<1x128xf32>
    %121 = arith.addf %119, %120 : vector<1x128xf32>
    %122 = math.tanh %121 : vector<1x128xf32>
    %123 = arith.mulf %118, %122 : vector<1x128xf32>
    %c3 = arith.constant 3 : index
    %c0_31 = arith.constant 0 : index
    %124 = vector.load %arg11[%c3, %c0_31] : memref<8x128xf32, #tpu.memory_space<vmem>>, vector<1x128xf32>
    tpu.vector_store %arg11[%c3, %c0_31], %123 {strides = array<i32>} : memref<8x128xf32, #tpu.memory_space<vmem>>, vector<1x128xf32>,
    %125 = vector.extract_strided_slice %5 {offsets = [4, 0], sizes = [1, 512], strides = [1, 1]} : vector<8x512xf32> to vector<1x512xf32>
    %cst_32 = arith.constant dense<0.000000e+00> : vector<1x512xf32>
    %126 = tpu.matmul %123, %6, %cst_32 {dimension_numbers = #tpu.dot_dimension_numbers<[1], [0], [0], [1], [0, 0, 1, 1], [], []>} : vector<1x128xf32>, vector<128x512xf32>, vector<1x512xf32> -> vector<1x512xf32>
    %127 = arith.addf %125, %126 : vector<1x512xf32>
    %128 = vector.extract_strided_slice %127 {offsets = [0, 0], sizes = [1, 128], strides = [1, 1]} : vector<1x512xf32> to vector<1x128xf32>
    %129 = arith.negf %128 : vector<1x128xf32>
    %130 = math.exp %129 : vector<1x128xf32>
    %cst_33 = arith.constant 1.000000e+00 : f32
    %131 = vector.broadcast %cst_33 : f32 to vector<1x128xf32>
    %132 = arith.addf %131, %130 : vector<1x128xf32>
    %133 = arith.divf %131, %132 : vector<1x128xf32>
    %134 = vector.extract_strided_slice %127 {offsets = [0, 128], sizes = [1, 128], strides = [1, 1]} : vector<1x512xf32> to vector<1x128xf32>
    %135 = arith.negf %134 : vector<1x128xf32>
    %136 = math.exp %135 : vector<1x128xf32>
    %cst_34 = arith.constant 1.000000e+00 : f32
    %137 = vector.broadcast %cst_34 : f32 to vector<1x128xf32>
    %138 = arith.addf %137, %136 : vector<1x128xf32>
    %139 = arith.divf %137, %138 : vector<1x128xf32>
    %140 = vector.extract_strided_slice %127 {offsets = [0, 256], sizes = [1, 128], strides = [1, 1]} : vector<1x512xf32> to vector<1x128xf32>
    %141 = math.tanh %140 : vector<1x128xf32>
    %142 = vector.extract_strided_slice %127 {offsets = [0, 384], sizes = [1, 128], strides = [1, 1]} : vector<1x512xf32> to vector<1x128xf32>
    %143 = arith.negf %142 : vector<1x128xf32>
    %144 = math.exp %143 : vector<1x128xf32>
    %cst_35 = arith.constant 1.000000e+00 : f32
    %145 = vector.broadcast %cst_35 : f32 to vector<1x128xf32>
    %146 = arith.addf %145, %144 : vector<1x128xf32>
    %147 = arith.divf %145, %146 : vector<1x128xf32>
    %148 = arith.mulf %139, %121 : vector<1x128xf32>
    %149 = arith.mulf %133, %141 : vector<1x128xf32>
    %150 = arith.addf %148, %149 : vector<1x128xf32>
    %151 = math.tanh %150 : vector<1x128xf32>
    %152 = arith.mulf %147, %151 : vector<1x128xf32>
    %c4 = arith.constant 4 : index
    %c0_36 = arith.constant 0 : index
    %153 = vector.load %arg11[%c4, %c0_36] : memref<8x128xf32, #tpu.memory_space<vmem>>, vector<1x128xf32>
    tpu.vector_store %arg11[%c4, %c0_36], %152 {strides = array<i32>} : memref<8x128xf32, #tpu.memory_space<vmem>>, vector<1x128xf32>,
    %154 = vector.extract_strided_slice %5 {offsets = [5, 0], sizes = [1, 512], strides = [1, 1]} : vector<8x512xf32> to vector<1x512xf32>
    %cst_37 = arith.constant dense<0.000000e+00> : vector<1x512xf32>
    %155 = tpu.matmul %152, %6, %cst_37 {dimension_numbers = #tpu.dot_dimension_numbers<[1], [0], [0], [1], [0, 0, 1, 1], [], []>} : vector<1x128xf32>, vector<128x512xf32>, vector<1x512xf32> -> vector<1x512xf32>
    %156 = arith.addf %154, %155 : vector<1x512xf32>
    %157 = vector.extract_strided_slice %156 {offsets = [0, 0], sizes = [1, 128], strides = [1, 1]} : vector<1x512xf32> to vector<1x128xf32>
    %158 = arith.negf %157 : vector<1x128xf32>
    %159 = math.exp %158 : vector<1x128xf32>
    %cst_38 = arith.constant 1.000000e+00 : f32
    %160 = vector.broadcast %cst_38 : f32 to vector<1x128xf32>
    %161 = arith.addf %160, %159 : vector<1x128xf32>
    %162 = arith.divf %160, %161 : vector<1x128xf32>
    %163 = vector.extract_strided_slice %156 {offsets = [0, 128], sizes = [1, 128], strides = [1, 1]} : vector<1x512xf32> to vector<1x128xf32>
    %164 = arith.negf %163 : vector<1x128xf32>
    %165 = math.exp %164 : vector<1x128xf32>
    %cst_39 = arith.constant 1.000000e+00 : f32
    %166 = vector.broadcast %cst_39 : f32 to vector<1x128xf32>
    %167 = arith.addf %166, %165 : vector<1x128xf32>
    %168 = arith.divf %166, %167 : vector<1x128xf32>
    %169 = vector.extract_strided_slice %156 {offsets = [0, 256], sizes = [1, 128], strides = [1, 1]} : vector<1x512xf32> to vector<1x128xf32>
    %170 = math.tanh %169 : vector<1x128xf32>
    %171 = vector.extract_strided_slice %156 {offsets = [0, 384], sizes = [1, 128], strides = [1, 1]} : vector<1x512xf32> to vector<1x128xf32>
    %172 = arith.negf %171 : vector<1x128xf32>
    %173 = math.exp %172 : vector<1x128xf32>
    %cst_40 = arith.constant 1.000000e+00 : f32
    %174 = vector.broadcast %cst_40 : f32 to vector<1x128xf32>
    %175 = arith.addf %174, %173 : vector<1x128xf32>
    %176 = arith.divf %174, %175 : vector<1x128xf32>
    %177 = arith.mulf %168, %150 : vector<1x128xf32>
    %178 = arith.mulf %162, %170 : vector<1x128xf32>
    %179 = arith.addf %177, %178 : vector<1x128xf32>
    %180 = math.tanh %179 : vector<1x128xf32>
    %181 = arith.mulf %176, %180 : vector<1x128xf32>
    %c5 = arith.constant 5 : index
    %c0_41 = arith.constant 0 : index
    %182 = vector.load %arg11[%c5, %c0_41] : memref<8x128xf32, #tpu.memory_space<vmem>>, vector<1x128xf32>
    tpu.vector_store %arg11[%c5, %c0_41], %181 {strides = array<i32>} : memref<8x128xf32, #tpu.memory_space<vmem>>, vector<1x128xf32>,
    %183 = vector.extract_strided_slice %5 {offsets = [6, 0], sizes = [1, 512], strides = [1, 1]} : vector<8x512xf32> to vector<1x512xf32>
    %cst_42 = arith.constant dense<0.000000e+00> : vector<1x512xf32>
    %184 = tpu.matmul %181, %6, %cst_42 {dimension_numbers = #tpu.dot_dimension_numbers<[1], [0], [0], [1], [0, 0, 1, 1], [], []>} : vector<1x128xf32>, vector<128x512xf32>, vector<1x512xf32> -> vector<1x512xf32>
    %185 = arith.addf %183, %184 : vector<1x512xf32>
    %186 = vector.extract_strided_slice %185 {offsets = [0, 0], sizes = [1, 128], strides = [1, 1]} : vector<1x512xf32> to vector<1x128xf32>
    %187 = arith.negf %186 : vector<1x128xf32>
    %188 = math.exp %187 : vector<1x128xf32>
    %cst_43 = arith.constant 1.000000e+00 : f32
    %189 = vector.broadcast %cst_43 : f32 to vector<1x128xf32>
    %190 = arith.addf %189, %188 : vector<1x128xf32>
    %191 = arith.divf %189, %190 : vector<1x128xf32>
    %192 = vector.extract_strided_slice %185 {offsets = [0, 128], sizes = [1, 128], strides = [1, 1]} : vector<1x512xf32> to vector<1x128xf32>
    %193 = arith.negf %192 : vector<1x128xf32>
    %194 = math.exp %193 : vector<1x128xf32>
    %cst_44 = arith.constant 1.000000e+00 : f32
    %195 = vector.broadcast %cst_44 : f32 to vector<1x128xf32>
    %196 = arith.addf %195, %194 : vector<1x128xf32>
    %197 = arith.divf %195, %196 : vector<1x128xf32>
    %198 = vector.extract_strided_slice %185 {offsets = [0, 256], sizes = [1, 128], strides = [1, 1]} : vector<1x512xf32> to vector<1x128xf32>
    %199 = math.tanh %198 : vector<1x128xf32>
    %200 = vector.extract_strided_slice %185 {offsets = [0, 384], sizes = [1, 128], strides = [1, 1]} : vector<1x512xf32> to vector<1x128xf32>
    %201 = arith.negf %200 : vector<1x128xf32>
    %202 = math.exp %201 : vector<1x128xf32>
    %cst_45 = arith.constant 1.000000e+00 : f32
    %203 = vector.broadcast %cst_45 : f32 to vector<1x128xf32>
    %204 = arith.addf %203, %202 : vector<1x128xf32>
    %205 = arith.divf %203, %204 : vector<1x128xf32>
    %206 = arith.mulf %197, %179 : vector<1x128xf32>
    %207 = arith.mulf %191, %199 : vector<1x128xf32>
    %208 = arith.addf %206, %207 : vector<1x128xf32>
    %209 = math.tanh %208 : vector<1x128xf32>
    %210 = arith.mulf %205, %209 : vector<1x128xf32>
    %c6 = arith.constant 6 : index
    %c0_46 = arith.constant 0 : index
    %211 = vector.load %arg11[%c6, %c0_46] : memref<8x128xf32, #tpu.memory_space<vmem>>, vector<1x128xf32>
    tpu.vector_store %arg11[%c6, %c0_46], %210 {strides = array<i32>} : memref<8x128xf32, #tpu.memory_space<vmem>>, vector<1x128xf32>,
    %212 = vector.extract_strided_slice %5 {offsets = [7, 0], sizes = [1, 512], strides = [1, 1]} : vector<8x512xf32> to vector<1x512xf32>
    %cst_47 = arith.constant dense<0.000000e+00> : vector<1x512xf32>
    %213 = tpu.matmul %210, %6, %cst_47 {dimension_numbers = #tpu.dot_dimension_numbers<[1], [0], [0], [1], [0, 0, 1, 1], [], []>} : vector<1x128xf32>, vector<128x512xf32>, vector<1x512xf32> -> vector<1x512xf32>
    %214 = arith.addf %212, %213 : vector<1x512xf32>
    %215 = vector.extract_strided_slice %214 {offsets = [0, 0], sizes = [1, 128], strides = [1, 1]} : vector<1x512xf32> to vector<1x128xf32>
    %216 = arith.negf %215 : vector<1x128xf32>
    %217 = math.exp %216 : vector<1x128xf32>
    %cst_48 = arith.constant 1.000000e+00 : f32
    %218 = vector.broadcast %cst_48 : f32 to vector<1x128xf32>
    %219 = arith.addf %218, %217 : vector<1x128xf32>
    %220 = arith.divf %218, %219 : vector<1x128xf32>
    %221 = vector.extract_strided_slice %214 {offsets = [0, 128], sizes = [1, 128], strides = [1, 1]} : vector<1x512xf32> to vector<1x128xf32>
    %222 = arith.negf %221 : vector<1x128xf32>
    %223 = math.exp %222 : vector<1x128xf32>
    %cst_49 = arith.constant 1.000000e+00 : f32
    %224 = vector.broadcast %cst_49 : f32 to vector<1x128xf32>
    %225 = arith.addf %224, %223 : vector<1x128xf32>
    %226 = arith.divf %224, %225 : vector<1x128xf32>
    %227 = vector.extract_strided_slice %214 {offsets = [0, 256], sizes = [1, 128], strides = [1, 1]} : vector<1x512xf32> to vector<1x128xf32>
    %228 = math.tanh %227 : vector<1x128xf32>
    %229 = vector.extract_strided_slice %214 {offsets = [0, 384], sizes = [1, 128], strides = [1, 1]} : vector<1x512xf32> to vector<1x128xf32>
    %230 = arith.negf %229 : vector<1x128xf32>
    %231 = math.exp %230 : vector<1x128xf32>
    %cst_50 = arith.constant 1.000000e+00 : f32
    %232 = vector.broadcast %cst_50 : f32 to vector<1x128xf32>
    %233 = arith.addf %232, %231 : vector<1x128xf32>
    %234 = arith.divf %232, %233 : vector<1x128xf32>
    %235 = arith.mulf %226, %208 : vector<1x128xf32>
    %236 = arith.mulf %220, %228 : vector<1x128xf32>
    %237 = arith.addf %235, %236 : vector<1x128xf32>
    %238 = math.tanh %237 : vector<1x128xf32>
    %239 = arith.mulf %234, %238 : vector<1x128xf32>
    %c7 = arith.constant 7 : index
    %c0_51 = arith.constant 0 : index
    %240 = vector.load %arg11[%c7, %c0_51] : memref<8x128xf32, #tpu.memory_space<vmem>>, vector<1x128xf32>
    tpu.vector_store %arg11[%c7, %c0_51], %239 {strides = array<i32>} : memref<8x128xf32, #tpu.memory_space<vmem>>, vector<1x128xf32>,
    %c0_52 = arith.constant 0 : index
    %c0_53 = arith.constant 0 : index
    %241 = vector.load %arg9[%c0_52, %c0_53] : memref<1x128xf32, #tpu.memory_space<vmem>>, vector<1x128xf32>
    tpu.vector_store %arg9[%c0_52, %c0_53], %239 {strides = array<i32>} : memref<1x128xf32, #tpu.memory_space<vmem>>, vector<1x128xf32>,
    %c0_54 = arith.constant 0 : index
    %c0_55 = arith.constant 0 : index
    %242 = vector.load %arg10[%c0_54, %c0_55] : memref<1x128xf32, #tpu.memory_space<vmem>>, vector<1x128xf32>
    tpu.vector_store %arg10[%c0_54, %c0_55], %237 {strides = array<i32>} : memref<1x128xf32, #tpu.memory_space<vmem>>, vector<1x128xf32>,
    %c0_56 = arith.constant 0 : index
    %c0_57 = arith.constant 0 : index
    %243 = vector.load %arg11[%c0_56, %c0_57] : memref<8x128xf32, #tpu.memory_space<vmem>>, vector<8x128xf32>
    %c0_58 = arith.constant 0 : index
    %c0_59 = arith.constant 0 : index
    %244 = vector.load %arg6[%c0_58, %c0_59] : memref<1x128xf32, #tpu.memory_space<vmem>>, vector<1x128xf32>
    %245 = vector.broadcast %244 : vector<1x128xf32> to vector<8x128xf32>
    %246 = arith.mulf %243, %245 : vector<8x128xf32>
    %cst_60 = arith.constant dense<0.000000e+00> : vector<8xf32>
    %247 = vector.multi_reduction <add>, %246, %cst_60 [1] : vector<8x128xf32> to vector<8xf32>
    %248 = vector.shape_cast %247 : vector<8xf32> to vector<8x1xf32>
    %c0_61 = arith.constant 0 : index
    %c0_62 = arith.constant 0 : index
    %249 = vector.load %arg7[%c0_61, %c0_62] : memref<1x1xf32, #tpu.memory_space<vmem>>, vector<1x1xf32>
    %250 = vector.broadcast %249 : vector<1x1xf32> to vector<8x1xf32>
    %251 = arith.addf %248, %250 : vector<8x1xf32>
    %c0_63 = arith.constant 0 : index
    %c0_64 = arith.constant 0 : index
    %252 = vector.load %arg8[%c0_63, %c0_64] : memref<8x1xf32, #tpu.memory_space<vmem>>, vector<8x1xf32>
    tpu.vector_store %arg8[%c0_63, %c0_64], %251 {strides = array<i32>} : memref<8x1xf32, #tpu.memory_space<vmem>>, vector<8x1xf32>,
    return
  }
}

</mosaic_0001>

<bundles_post_ra>
// kernel: tpu_custom_call.1
= control target key start
LH: loop header
LB: loop body
LE: loop exit
PB: predicated region body
PF: predicated region fallthrough
CT: control target
= control target key end

     0   :  { %s3156_s0 = inlined_call_operand.hbm [shape: f32[8,32], index: 0, kind: input, shape index: {}]   ;;  %s3157_s1 = inlined_call_operand.vmem [shape: f32[1,128], index: 1, kind: input, shape index: {}]   ;;  %s3158_s2 = inlined_call_operand.vmem [shape: f32[1,128], index: 2, kind: input, shape index: {}]   ;;  %s3159_s3 = inlined_call_operand.hbm [shape: f32[32,512], index: 3, kind: input, shape index: {}]   ;;  %s3160_s4 = inlined_call_operand.hbm [shape: f32[128,512], index: 4, kind: input, shape index: {}]   ;;  %s3161_s5 = inlined_call_operand.vmem [shape: f32[1,512], index: 5, kind: input, shape index: {}]   ;;  %s3162_s6 = inlined_call_operand.vmem [shape: f32[1,128], index: 6, kind: input, shape index: {}]   ;;  %s3163_s7 = inlined_call_operand.<no memory space> [shape: f32[1,1], index: 7, kind: input, shape index: {}]   ;;  %s3164_s8 = inlined_call_operand.vmem [shape: f32[8,1], index: 8, kind: output, shape index: {0}]   ;;  %s3165_s9 = inlined_call_operand.hbm [shape: f32[1,128], index: 9, kind: output, shape index: {1}]   ;;  %s3166_s10 = inlined_call_operand.hbm [shape: f32[1,128], index: 10, kind: output, shape index: {2}]  }
   0x1   :  { %v16_v0 = vstv %s3163_s7 }
   0x2   :  { %17 = vst [vmem:[#allocation3] sm:$0x1] %v16_v0 }
   0x3   :  { %18 = vsyncpa [#allocation5], 0 }
   0x4   :  { %19 = vsyncpa [#allocation8], 0 }
   0x5   :  { %20 = vsyncpa [#allocation6], 0 }
   0x6   :  { %21 = vsyncpa [#allocation12], 0  ;;  %s2210_s15 = smov [#allocation7]  }
   0x7   :  { %s41_s16 = sshll.u32 %s2210_s15, 4  ;;  %s42_s16 = int_to_ptr.vmem [resolvable:$true] %s41_s16 }
   0x8   :  { %s2110_s17 = scalar_lea.vmem %s42_s16, 2048  ;;  %p2115_p1 = scmp.lt.s32.totalorder %s42_s16, %s42_s16 }
   0x9   :  { %p2111_p0 = scmp.ne.s32.totalorder %s42_s16, %s2110_s17  ;;  %p2116_p2 = scmp.lt.s32.totalorder %s2110_s17, %s2110_s17 }
   0xb   :  { %p2117_p3 = por %p2116_p2, %p2115_p1 }
   0xd   :  { %p2118_p4 = pnand %p2117_p3, %p2111_p0 }
   0xf   :  { %2121 = shalt.err (!%p2118_p4)
}
  0x10   :  { %s2211_s18 = smov 512   ;;  %s2212_s19 = smov 32  }
  0x11   :  { %47 = dma.hbm_to_vmem [thread:$0]  %s3159_s3, 2048, %s42_s16, [#allocation8], %s2211_s18, %s2211_s18, %s2212_s19  }
  0x12   :  { %s2213_s7 = smov [#allocation4]   ;;  %s2214_s23 = smov [#allocation9]  }
  0x13   :  { %s28_s22 = sshll.u32 %s2213_s7, 4  ;;  %s53_s24 = sshll.u32 %s2214_s23, 4  ;;  %s29_s22 = int_to_ptr.vmem [resolvable:$true] %s28_s22  ;;  %s54_s24 = int_to_ptr.vmem [resolvable:$true] %s53_s24 }
  0x14   :  { %s2130_s25 = scalar_lea.vmem %s29_s22, 128  ;;  %p2135_p6 = scmp.lt.s32.totalorder %s29_s22, %s29_s22 }
  0x15   :  { %p2131_p5 = scmp.ne.s32.totalorder %s29_s22, %s2130_s25  ;;  %p2136_p7 = scmp.lt.s32.totalorder %s2130_s25, %s2130_s25 }
  0x17   :  { %p2137_p8 = por %p2136_p7, %p2135_p6 }
  0x19   :  { %p2138_p9 = pnand %p2137_p8, %p2131_p5 }
  0x1b   :  { %2141 = shalt.err (!%p2138_p9)
}
  0x1c   :  { %31 = dma.hbm_to_vmem [thread:$0]  %s3156_s0, 128, %s29_s22, [#allocation5]  }
  0x1d   :  { %s2150_s28 = scalar_lea.vmem %s54_s24, 8192  ;;  %p2155_p11 = scmp.lt.s32.totalorder %s54_s24, %s54_s24 }
  0x1e   :  { %p2151_p10 = scmp.ne.s32.totalorder %s54_s24, %s2150_s28  ;;  %p2156_p12 = scmp.lt.s32.totalorder %s2150_s28, %s2150_s28 }
  0x20   :  { %p2157_p13 = por %p2156_p12, %p2155_p11 }
  0x22   :  { %p2158_p0 = pnand %p2157_p13, %p2151_p10 }
  0x24   :  { %2161 = shalt.err (!%p2158_p0)
}
  0x25   :  { %59 = dma.hbm_to_vmem [thread:$0]  %s3160_s4, 8192, %s54_s24, [#allocation8], %s2211_s18, %s2211_s18, %s2212_s19  }
  0x26   :  { %2202 = dma.done.wait [#allocation5], 128  }
  0x27   :  { %2203 = vsyncadd [#allocation5], 4294967168 }
  0x28   :  { %2204 = dma.done.wait [#allocation8], 10240  }
  0x29   :  { %2205 = vsyncadd [#allocation8], 4294957056  ;;  %v3167_v1 = vmov 0.0   ;;  %v89_v2 = vld [vmem:[#allocation7 + $0x68] sm:$0xff]  ;;  %v91_v3 = vld [vmem:[#allocation7 + $0x78] sm:$0xff]  ;;  %vm114_vm0 = vcmask 261120  }
  0x2a   :  { %182 = vmatprep.mubr.f32.mxu0 %v3167_v1  ;;  %253 = vmatprep.mubr.f32.mxu1 %v3167_v1  ;;  %v88_v4 = vld [vmem:[#allocation7 + $0x60] sm:$0xff]  ;;  %v90_v5 = vld [vmem:[#allocation7 + $0x70] sm:$0xff]  ;;  %v85_v6 = vld [vmem:[#allocation7 + $0x48] sm:$0xff]  ;;  %s2216_s13 = smov [#allocation10]   ;;  %s2217_s15 = smov [#allocation11]  }
  0x2b   :  { %142 = vmatprep.subr.mxu0 %v89_v2  ;;  %213 = vmatprep.subr.mxu1 %v91_v3  ;;  %v87_v7 = vld [vmem:[#allocation7 + $0x58] sm:$0xff]  ;;  %v84_v8 = vld [vmem:[#allocation7 + $0x40] sm:$0xff]  ;;  %v86_v9 = vld [vmem:[#allocation7 + $0x50] sm:$0xff]  ;;  %s1848_s14 = sshll.u32 %s2216_s13, 4  ;;  %s1858_s16 = sshll.u32 %s2217_s15, 4  ;;  %s1849_s14 = int_to_ptr.vmem [resolvable:$true] %s1848_s14  ;;  %s1859_s16 = int_to_ptr.vmem [resolvable:$true] %s1858_s16 }
  0x2c   :  { %143 = vmatpush1.msra.mxu0 %v88_v4  ;;  %214 = vmatpush1.msra.mxu1 %v90_v5  ;;  %v81_v10 = vld [vmem:[#allocation7 + $0x28] sm:$0xff]  ;;  %v83_v11 = vld [vmem:[#allocation7 + $0x38] sm:$0xff]  ;;  %v80_v12 = vld [vmem:[#allocation7 + $0x20] sm:$0xff]  ;;  %s2162_s17 = scalar_lea.vmem %s1849_s14, 16  ;;  %s2166_s18 = scalar_lea.vmem %s1849_s14, 32 }
  0x2d   :  { %144 = vmatprep.subr.mxu0 %v85_v6  ;;  %215 = vmatprep.subr.mxu1 %v87_v7  ;;  %v82_v13 = vld [vmem:[#allocation7 + $0x30] sm:$0xff]  ;;  %v77_v14 = vld [vmem:[#allocation7 + $0x8] sm:$0xff]  ;;  %v79_v15 = vld [vmem:[#allocation7 + $0x18] sm:$0xff]  ;;  %p2163_p1 = scmp.ne.s32.totalorder %s1849_s14, %s2162_s17  ;;  %p2167_p2 = scmp.lt.s32.totalorder %s1849_s14, %s1849_s14 }
  0x2e   :  { %145 = vmatpush1.msra.mxu0 %v84_v8  ;;  %216 = vmatpush1.msra.mxu1 %v86_v9  ;;  %v76_v16 = vld [vmem:[#allocation7] sm:$0xff]  ;;  %v78_v17 = vld [vmem:[#allocation7 + $0x10] sm:$0xff]  ;;  %v75_v18 = vld [vmem:[#allocation4] sm:$0xff]  ;;  %p2168_p3 = scmp.lt.s32.totalorder %s2166_s18, %s2162_s17 }
  0x2f   :  { %146 = vmatprep.subr.mxu0 %v81_v10  ;;  %217 = vmatprep.subr.mxu1 %v83_v11  ;;  %v2287_v19 = vld [vmem:[#allocation9 + $0x1e8] sm:$0xff]  ;;  %v2289_v20 = vld [vmem:[#allocation9 + $0x1f8] sm:$0xff]  ;;  %v2291_v21 = vld [vmem:[#allocation9 + $0x1e0] sm:$0xff] }
  0x30   :  { %147 = vmatpush1.msra.mxu0 %v80_v12  ;;  %218 = vmatpush1.msra.mxu1 %v82_v13  ;;  %3262 = vst [vmem:[#allocation17_spill] sm:$0xff] %v2287_v19  ;;  %3263 = vst [vmem:[#allocation18_spill] sm:$0xff] %v2289_v20  ;;  %v2293_v22 = vld [vmem:[#allocation9 + $0x1f0] sm:$0xff]  ;;  %v2296_v23 = vld [vmem:[#allocation9 + $0x1c8] sm:$0xff]  ;;  %p2169_p4 = por %p2168_p3, %p2167_p2 }
  0x31   :  { %148 = vmatprep.subr.mxu0 %v77_v14  ;;  %219 = vmatprep.subr.mxu1 %v79_v15  ;;  %v2298_v24 = vld [vmem:[#allocation9 + $0x1d8] sm:$0xff]  ;;  %v2301_v25 = vld [vmem:[#allocation9 + $0x1c0] sm:$0xff]  ;;  %v2303_v26 = vld [vmem:[#allocation9 + $0x1d0] sm:$0xff] }
  0x32   :  { %149 = vmatpush1.msra.mxu0 %v76_v16  ;;  %220 = vmatpush1.msra.mxu1 %v78_v17  ;;  %v2307_v27 = vld [vmem:[#allocation9 + $0x1a8] sm:$0xff]  ;;  %v2309_v28 = vld [vmem:[#allocation9 + $0x1b8] sm:$0xff]  ;;  %v2313_v29 = vld [vmem:[#allocation9 + $0x1a0] sm:$0xff]  ;;  %p2170_p5 = pnand %p2169_p4, %p2163_p1 }
  0x33   :  { %1874 = vmatmul.mubr.msk.f32.vlgmr.msra.gmra.mxu0 %vm114_vm0, %v75_v18  ;;  %326 = vmatprep.subr.mxu0 %v2287_v19  ;;  %v2315_v30 = vld [vmem:[#allocation9 + $0x1b0] sm:$0xff]  ;;  %v2319_v31 = vld [vmem:[#allocation9 + $0x188] sm:$0xff]  ;;  %v2321_v32 = vld [vmem:[#allocation9 + $0x198] sm:$0xff] }
  0x34   :  { %397 = vmatprep.subr.mxu1 %v2289_v20  ;;  %1875 = vmatmul.mubr.msk.f32.vlgmr.msra.gmra.mxu1 %vm114_vm0, %v75_v18  ;;  %v2325_v33 = vld [vmem:[#allocation9 + $0x180] sm:$0xff]  ;;  %v2327_v34 = vld [vmem:[#allocation9 + $0x190] sm:$0xff]  ;;  %v2331_v35 = vld [vmem:[#allocation9 + $0x168] sm:$0xff] }
  0x35   :  { %327 = vmatpush1.msra.mxu0 %v2291_v21  ;;  %398 = vmatpush1.msra.mxu1 %v2293_v22  ;;  %v2333_v36 = vld [vmem:[#allocation9 + $0x178] sm:$0xff]  ;;  %v2337_v37 = vld [vmem:[#allocation9 + $0x160] sm:$0xff]  ;;  %v2339_v38 = vld [vmem:[#allocation9 + $0x170] sm:$0xff] }
  0x36   :  { %328 = vmatprep.subr.mxu0 %v2296_v23  ;;  %399 = vmatprep.subr.mxu1 %v2298_v24  ;;  %v2343_v39 = vld [vmem:[#allocation9 + $0x148] sm:$0xff]  ;;  %v2345_v40 = vld [vmem:[#allocation9 + $0x158] sm:$0xff]  ;;  %v2349_v41 = vld [vmem:[#allocation9 + $0x140] sm:$0xff] }
  0x37   :  { %329 = vmatpush1.msra.mxu0 %v2301_v25  ;;  %400 = vmatpush1.msra.mxu1 %v2303_v26  ;;  %v2351_v42 = vld [vmem:[#allocation9 + $0x150] sm:$0xff]  ;;  %v2355_v43 = vld [vmem:[#allocation9 + $0x128] sm:$0xff]  ;;  %v2357_v44 = vld [vmem:[#allocation9 + $0x138] sm:$0xff] }
  0x38   :  { %330 = vmatprep.subr.mxu0 %v2307_v27  ;;  %401 = vmatprep.subr.mxu1 %v2309_v28  ;;  %v2361_v45 = vld [vmem:[#allocation9 + $0x120] sm:$0xff]  ;;  %v2363_v46 = vld [vmem:[#allocation9 + $0x130] sm:$0xff]  ;;  %v2367_v47 = vld [vmem:[#allocation9 + $0x108] sm:$0xff] }
  0x39   :  { %331 = vmatpush1.msra.mxu0 %v2313_v29  ;;  %402 = vmatpush1.msra.mxu1 %v2315_v30  ;;  %v2369_v48 = vld [vmem:[#allocation9 + $0x118] sm:$0xff]  ;;  %v2373_v49 = vld [vmem:[#allocation9 + $0x100] sm:$0xff]  ;;  %v2375_v50 = vld [vmem:[#allocation9 + $0x110] sm:$0xff] }
  0x3a   :  { %332 = vmatprep.subr.mxu0 %v2319_v31  ;;  %403 = vmatprep.subr.mxu1 %v2321_v32  ;;  %v2379_v51 = vld [vmem:[#allocation9 + $0xe8] sm:$0xff]  ;;  %v2381_v52 = vld [vmem:[#allocation9 + $0xf8] sm:$0xff]  ;;  %v2385_v53 = vld [vmem:[#allocation9 + $0xe0] sm:$0xff] }
  0x3b   :  { %333 = vmatpush1.msra.mxu0 %v2325_v33  ;;  %404 = vmatpush1.msra.mxu1 %v2327_v34  ;;  %v2387_v54 = vld [vmem:[#allocation9 + $0xf0] sm:$0xff]  ;;  %v2391_v55 = vld [vmem:[#allocation9 + $0xc8] sm:$0xff]  ;;  %v2393_v56 = vld [vmem:[#allocation9 + $0xd8] sm:$0xff] }
  0x3c   :  { %334 = vmatprep.subr.mxu0 %v2331_v35  ;;  %405 = vmatprep.subr.mxu1 %v2333_v36  ;;  %v2397_v57 = vld [vmem:[#allocation9 + $0xc0] sm:$0xff]  ;;  %v2399_v58 = vld [vmem:[#allocation9 + $0xd0] sm:$0xff]  ;;  %v2403_v59 = vld [vmem:[#allocation9 + $0xa8] sm:$0xff] }
  0x3d   :  { %335 = vmatpush1.msra.mxu0 %v2337_v37  ;;  %406 = vmatpush1.msra.mxu1 %v2339_v38  ;;  %v2405_v60 = vld [vmem:[#allocation9 + $0xb8] sm:$0xff]  ;;  %v2409_v61 = vld [vmem:[#allocation9 + $0xa0] sm:$0xff]  ;;  %v2411_v62 = vld [vmem:[#allocation9 + $0xb0] sm:$0xff] }
  0x3e   :  { %336 = vmatprep.subr.mxu0 %v2343_v39  ;;  %407 = vmatprep.subr.mxu1 %v2345_v40  ;;  %v2415_v63 = vld [vmem:[#allocation9 + $0x88] sm:$0xff]  ;;  %v2417_v0 = vld [vmem:[#allocation9 + $0x98] sm:$0xff]  ;;  %v2421_v2 = vld [vmem:[#allocation9 + $0x80] sm:$0xff] }
  0x3f   :  { %337 = vmatpush1.msra.mxu0 %v2349_v41  ;;  %408 = vmatpush1.msra.mxu1 %v2351_v42  ;;  %3264 = vst [vmem:[#allocation19_spill] sm:$0xff] %v2415_v63  ;;  %3265 = vst [vmem:[#allocation20_spill] sm:$0xff] %v2417_v0  ;;  %v2423_v3 = vld [vmem:[#allocation9 + $0x90] sm:$0xff]  ;;  %v2427_v4 = vld [vmem:[#allocation9 + $0x68] sm:$0xff] }
  0x40   :  { %338 = vmatprep.subr.mxu0 %v2355_v43  ;;  %409 = vmatprep.subr.mxu1 %v2357_v44  ;;  %3266 = vst [vmem:[#allocation21_spill] sm:$0xff] %v2421_v2  ;;  %3267 = vst [vmem:[#allocation22_spill] sm:$0xff] %v2423_v3  ;;  %v2429_v5 = vld [vmem:[#allocation9 + $0x78] sm:$0xff]  ;;  %v2433_v6 = vld [vmem:[#allocation9 + $0x60] sm:$0xff] }
  0x41   :  { %339 = vmatpush1.msra.mxu0 %v2361_v45  ;;  %410 = vmatpush1.msra.mxu1 %v2363_v46  ;;  %3268 = vst [vmem:[#allocation23_spill] sm:$0xff] %v2427_v4  ;;  %3269 = vst [vmem:[#allocation24_spill] sm:$0xff] %v2429_v5  ;;  %v2435_v7 = vld [vmem:[#allocation9 + $0x70] sm:$0xff]  ;;  %v2439_v8 = vld [vmem:[#allocation9 + $0x48] sm:$0xff] }
  0x42   :  { %340 = vmatprep.subr.mxu0 %v2367_v47  ;;  %411 = vmatprep.subr.mxu1 %v2369_v48  ;;  %3270 = vst [vmem:[#allocation25_spill] sm:$0xff] %v2433_v6  ;;  %3271 = vst [vmem:[#allocation26_spill] sm:$0xff] %v2435_v7  ;;  %v2441_v9 = vld [vmem:[#allocation9 + $0x58] sm:$0xff]  ;;  %v2445_v10 = vld [vmem:[#allocation9 + $0x40] sm:$0xff] }
  0x43   :  { %341 = vmatpush1.msra.mxu0 %v2373_v49  ;;  %412 = vmatpush1.msra.mxu1 %v2375_v50  ;;  %3272 = vst [vmem:[#allocation27_spill] sm:$0xff] %v2439_v8  ;;  %3273 = vst [vmem:[#allocation28_spill] sm:$0xff] %v2441_v9  ;;  %v2447_v11 = vld [vmem:[#allocation9 + $0x50] sm:$0xff]  ;;  %v2451_v12 = vld [vmem:[#allocation9 + $0x28] sm:$0xff] }
  0x44   :  { %342 = vmatprep.subr.mxu0 %v2379_v51  ;;  %413 = vmatprep.subr.mxu1 %v2381_v52  ;;  %3274 = vst [vmem:[#allocation29_spill] sm:$0xff] %v2445_v10  ;;  %3275 = vst [vmem:[#allocation30_spill] sm:$0xff] %v2447_v11  ;;  %v2453_v13 = vld [vmem:[#allocation9 + $0x38] sm:$0xff]  ;;  %v2457_v14 = vld [vmem:[#allocation9 + $0x20] sm:$0xff] }
  0x45   :  { %343 = vmatpush1.msra.mxu0 %v2385_v53  ;;  %414 = vmatpush1.msra.mxu1 %v2387_v54  ;;  %3276 = vst [vmem:[#allocation31_spill] sm:$0xff] %v2451_v12  ;;  %3277 = vst [vmem:[#allocation32_spill] sm:$0xff] %v2453_v13  ;;  %v2459_v15 = vld [vmem:[#allocation9 + $0x30] sm:$0xff]  ;;  %v2463_v16 = vld [vmem:[#allocation9 + $0x8] sm:$0xff] }
  0x46   :  { %344 = vmatprep.subr.mxu0 %v2391_v55  ;;  %415 = vmatprep.subr.mxu1 %v2393_v56  ;;  %3278 = vst [vmem:[#allocation33_spill] sm:$0xff] %v2457_v14  ;;  %3279 = vst [vmem:[#allocation34_spill] sm:$0xff] %v2459_v15  ;;  %v2465_v17 = vld [vmem:[#allocation9 + $0x18] sm:$0xff]  ;;  %v2469_v18 = vld [vmem:[#allocation9] sm:$0xff] }
  0x47   :  { %345 = vmatpush1.msra.mxu0 %v2397_v57  ;;  %416 = vmatpush1.msra.mxu1 %v2399_v58  ;;  %3280 = vst [vmem:[#allocation35_spill] sm:$0xff] %v2463_v16  ;;  %3281 = vst [vmem:[#allocation36_spill] sm:$0xff] %v2465_v17  ;;  %v2473_v1 = vld [vmem:[#allocation9 + $0x10] sm:$0xff] }
  0x48   :  { %346 = vmatprep.subr.mxu0 %v2403_v59  ;;  %417 = vmatprep.subr.mxu1 %v2405_v60  ;;  %3282 = vst [vmem:[#allocation37_spill] sm:$0xff] %v2469_v18  ;;  %3283 = vst [vmem:[#allocation38_spill] sm:$0xff] %v2473_v1 }
  0x49   :  { %347 = vmatpush1.msra.mxu0 %v2409_v61  ;;  %418 = vmatpush1.msra.mxu1 %v2411_v62 }
  0x4a   :  { %348 = vmatprep.subr.mxu0 %v2415_v63  ;;  %419 = vmatprep.subr.mxu1 %v2417_v0 }
  0x4b   :  { %349 = vmatpush1.msra.mxu0 %v2421_v2  ;;  %420 = vmatpush1.msra.mxu1 %v2423_v3 }
  0x4c   :  { %350 = vmatprep.subr.mxu0 %v2427_v4  ;;  %421 = vmatprep.subr.mxu1 %v2429_v5 }
  0x4d   :  { %351 = vmatpush1.msra.mxu0 %v2433_v6  ;;  %422 = vmatpush1.msra.mxu1 %v2435_v7 }
  0x4e   :  { %352 = vmatprep.subr.mxu0 %v2439_v8  ;;  %423 = vmatprep.subr.mxu1 %v2441_v9 }
  0x4f   :  { %353 = vmatpush1.msra.mxu0 %v2445_v10  ;;  %424 = vmatpush1.msra.mxu1 %v2447_v11  ;;  %v324_v11 = vld [vmem:[%s3157_s1] sm:$0x1] }
  0x50   :  { %354 = vmatprep.subr.mxu0 %v2451_v12  ;;  %425 = vmatprep.subr.mxu1 %v2453_v13  ;;  %v3284_v12 = vmov 0.0  }
  0x51   :  { %355 = vmatpush1.msra.mxu0 %v2457_v14  ;;  %426 = vmatpush1.msra.mxu1 %v2459_v15 }
  0x52   :  { %356 = vmatprep.subr.mxu0 %v2463_v16  ;;  %427 = vmatprep.subr.mxu1 %v2465_v17 }
  0x53   :  { %357 = vmatpush1.msra.mxu0 %v2469_v18  ;;  %390 = vmatprep.mubr.f32.mxu0 %v3284_v12 }
  0x54   :  { %428 = vmatpush1.msra.mxu1 %v2473_v1  ;;  %461 = vmatprep.mubr.f32.mxu1 %v3284_v12 }
  0x55   :  { %391 = vmatmul.mubr.f32.vlgmr.msra.gmra.mxu0 %v324_v11  ;;  %462 = vmatmul.mubr.f32.vlgmr.msra.gmra.mxu1 %v324_v11  ;;  %v3285_v11 = vld [vmem:[#allocation30_spill] sm:$0xff] }
  0x56   :  { %497 = vmatprep.subr.mxu0 %v2287_v19  ;;  %568 = vmatprep.subr.mxu1 %v2289_v20 }
  0x57   :  { %498 = vmatpush1.msra.mxu0 %v2291_v21  ;;  %569 = vmatpush1.msra.mxu1 %v2293_v22 }
  0x58   :  { %499 = vmatprep.subr.mxu0 %v2296_v23  ;;  %570 = vmatprep.subr.mxu1 %v2298_v24 }
  0x59   :  { %500 = vmatpush1.msra.mxu0 %v2301_v25  ;;  %571 = vmatpush1.msra.mxu1 %v2303_v26 }
  0x5a   :  { %501 = vmatprep.subr.mxu0 %v2307_v27  ;;  %572 = vmatprep.subr.mxu1 %v2309_v28 }
  0x5b   :  { %502 = vmatpush1.msra.mxu0 %v2313_v29  ;;  %573 = vmatpush1.msra.mxu1 %v2315_v30 }
  0x5c   :  { %503 = vmatprep.subr.mxu0 %v2319_v31  ;;  %574 = vmatprep.subr.mxu1 %v2321_v32 }
  0x5d   :  { %504 = vmatpush1.msra.mxu0 %v2325_v33  ;;  %575 = vmatpush1.msra.mxu1 %v2327_v34 }
  0x5e   :  { %505 = vmatprep.subr.mxu0 %v2331_v35  ;;  %576 = vmatprep.subr.mxu1 %v2333_v36 }
  0x5f   :  { %506 = vmatpush1.msra.mxu0 %v2337_v37  ;;  %577 = vmatpush1.msra.mxu1 %v2339_v38 }
  0x60   :  { %507 = vmatprep.subr.mxu0 %v2343_v39  ;;  %578 = vmatprep.subr.mxu1 %v2345_v40 }
  0x61   :  { %508 = vmatpush1.msra.mxu0 %v2349_v41  ;;  %579 = vmatpush1.msra.mxu1 %v2351_v42 }
  0x62   :  { %509 = vmatprep.subr.mxu0 %v2355_v43  ;;  %580 = vmatprep.subr.mxu1 %v2357_v44 }
  0x63   :  { %510 = vmatpush1.msra.mxu0 %v2361_v45  ;;  %581 = vmatpush1.msra.mxu1 %v2363_v46 }
  0x64   :  { %511 = vmatprep.subr.mxu0 %v2367_v47  ;;  %582 = vmatprep.subr.mxu1 %v2369_v48 }
  0x65   :  { %512 = vmatpush1.msra.mxu0 %v2373_v49  ;;  %583 = vmatpush1.msra.mxu1 %v2375_v50 }
  0x66   :  { %513 = vmatprep.subr.mxu0 %v2379_v51  ;;  %584 = vmatprep.subr.mxu1 %v2381_v52 }
  0x67   :  { %514 = vmatpush1.msra.mxu0 %v2385_v53  ;;  %585 = vmatpush1.msra.mxu1 %v2387_v54 }
  0x68   :  { %515 = vmatprep.subr.mxu0 %v2391_v55  ;;  %586 = vmatprep.subr.mxu1 %v2393_v56 }
  0x69   :  { %516 = vmatpush1.msra.mxu0 %v2397_v57  ;;  %587 = vmatpush1.msra.mxu1 %v2399_v58 }
  0x6a   :  { %517 = vmatprep.subr.mxu0 %v2403_v59  ;;  %588 = vmatprep.subr.mxu1 %v2405_v60 }
  0x6b   :  { %518 = vmatpush1.msra.mxu0 %v2409_v61  ;;  %589 = vmatpush1.msra.mxu1 %v2411_v62 }
  0x6c   :  { %519 = vmatprep.subr.mxu0 %v2415_v63  ;;  %590 = vmatprep.subr.mxu1 %v2417_v0  ;;  %v3286_v0 = vld [vmem:[#allocation31_spill] sm:$0xff] }
  0x6d   :  { %520 = vmatpush1.msra.mxu0 %v2421_v2  ;;  %591 = vmatpush1.msra.mxu1 %v2423_v3 }
  0x6e   :  { %521 = vmatprep.subr.mxu0 %v2427_v4  ;;  %592 = vmatprep.subr.mxu1 %v2429_v5 }
  0x6f   :  { %522 = vmatpush1.msra.mxu0 %v2433_v6  ;;  %593 = vmatpush1.msra.mxu1 %v2435_v7 }
  0x70   :  { %523 = vmatprep.subr.mxu0 %v2439_v8  ;;  %594 = vmatprep.subr.mxu1 %v2441_v9 }
  0x71   :  { %524 = vmatpush1.msra.mxu0 %v2445_v10  ;;  %595 = vmatpush1.msra.mxu1 %v3285_v11 }
  0x72   :  { %525 = vmatprep.subr.mxu0 %v3286_v0  ;;  %596 = vmatprep.subr.mxu1 %v2453_v13  ;;  %v94_v13 = vlaneseq }
  0x73   :  { %526 = vmatpush1.msra.mxu0 %v2457_v14  ;;  %597 = vmatpush1.msra.mxu1 %v2459_v15 }
  0x74   :  { %527 = vmatprep.subr.mxu0 %v2463_v16  ;;  %598 = vmatprep.subr.mxu1 %v2465_v17  ;;  %v95_v14 = vshrl.u32 %v94_v13, 7  ;;  %v92_v16 = vld [vmem:[%s3161_s5] sm:$0xf] }
  0x75   :  { %528 = vmatpush1.msra.mxu0 %v2469_v18  ;;  %561 = vmatprep.mubr.f32.mxu0 %v3284_v12 }
  0x76   :  { %599 = vmatpush1.msra.mxu1 %v2473_v1  ;;  %632 = vmatprep.mubr.f32.mxu1 %v3284_v12  ;;  %v96_v0 = vsub.s32 0, %v95_v14  ;;  %v100_v17 = vsub.s32 1, %v95_v14 }
  0x77   :  { %686 = vmatprep.subr.mxu0 %v2287_v19  ;;  %757 = vmatprep.subr.mxu1 %v2289_v20  ;;  %v108_v19 = vsub.s32 3, %v95_v14 }
  0x78   :  { %v97_v18 = vrot.slane %v92_v16, %v96_v0  ;;  %v101_v11 = vrot.slane %v92_v16, %v100_v17  ;;  %v104_v17 = vsub.s32 2, %v95_v14 }
  0x79   :  { %v109_v0 = vrot.slane %v92_v16, %v108_v19 }
  0x7a   :  { %v105_v2 = vrot.slane %v92_v16, %v104_v17  ;;  %v3288_v17 = vld [vmem:[#allocation19_spill] sm:$0xff] }
  0xf3   :  { %v184_v15 = vpop.f32.mrf.mxu0 }
  0xf4   :  { %v2555_v9 = vadd.f32 %v184_v15, %v97_v18  ;;  %v255_v1 = vpop.f32.mrf.mxu1 }
  0xf5   :  { %v186_v10 = vpop.f32.mrf.mxu0 }
  0xf6   :  { %3287 = vst [vmem:[#allocation39_spill] sm:$0xff] %v2555_v9  ;;  %v2557_v8 = vadd.f32 %v186_v10, %v101_v11  ;;  %v257_v7 = vpop.f32.mrf.mxu1  ;;  %v2564_v11 = vadd.f32 %v255_v1, %v105_v2 }
  0xf7   :  { %v2561_v18 = vadd.f32 %v257_v7, %v109_v0 }
 0x115   :  { %v392_v12 = vpop.f32.mrf.mxu0  ;;  %v463_v4 = vpop.f32.mrf.mxu1 }
 0x116   :  { %v468_v20 = vadd.f32 %v392_v12, %v2555_v9 }
 0x117   :  { %v394_v13 = vpop.f32.mrf.mxu0  ;;  %v465_v15 = vpop.f32.mrf.mxu1 }
 0x118   :  { %v1876_v6 = vmul.f32 -1.442695, %v468_v20  ;;  %v469_v5 = vadd.f32 %v394_v13, %v2557_v8  ;;  %v471_v10 = vadd.f32 %v465_v15, %v2561_v18  ;;  %v470_v20 = vadd.f32 %v463_v4, %v2564_v11  ;;  %v3289_v15 = vld [vmem:[#allocation20_spill] sm:$0xff] }
 0x11a   :  { %1910 = vpow2.f32 %v1876_v6  ;;  %v1877_v3 = vmul.f32 -1.442695, %v469_v5  ;;  %v1878_v12 = vmul.f32 -1.442695, %v471_v10  ;;  %v325_v6 = vld [vmem:[%s3158_s2] sm:$0x1] }
 0x11b   :  { %v3290_v10 = vld [vmem:[#allocation21_spill] sm:$0xff] }
 0x11c   :  { %1912 = vpow2.f32 %v1877_v3 }
 0x11d   :  { %1914 = vpow2.f32 %v1878_v12  ;;  %v3291_v12 = vld [vmem:[#allocation22_spill] sm:$0xff] }
 0x127   :  { %v1911_v9 = vpop.eup %1910 }
 0x128   :  { %v475_v63 = vadd.f32 1.0, %v1911_v9 }
 0x129   :  { %v1913_v13 = vpop.eup %1912 }
 0x12a   :  { %1916 = vrcp.f32 %v475_v63  ;;  %v481_v5 = vadd.f32 1.0, %v1913_v13  ;;  %v1915_v19 = vpop.eup %1914  ;;  %v3293_v13 = vld [vmem:[#allocation24_spill] sm:$0xff] }
 0x12b   :  { %1918 = vtanh.f32 %v470_v20  ;;  %v488_v2 = vadd.f32 1.0, %v1915_v19  ;;  %v3292_v20 = vld [vmem:[#allocation23_spill] sm:$0xff]  ;;  %v3295_v19 = vld [vmem:[#allocation26_spill] sm:$0xff] }
 0x12c   :  { %1920 = vrcp.f32 %v481_v5  ;;  %v3294_v5 = vld [vmem:[#allocation25_spill] sm:$0xff] }
 0x12d   :  { %1922 = vrcp.f32 %v488_v2  ;;  %v3300_v2 = vld [vmem:[#allocation31_spill] sm:$0xff] }
 0x137   :  { %v1917_v3 = vpop.eup %1916 }
 0x138   :  { %v1919_v7 = vpop.eup %1918 }
 0x139   :  { %v1921_v1 = vpop.eup %1920  ;;  %v492_v14 = vmul.f32 %v1919_v7, %v1917_v3  ;;  %v3296_v3 = vld [vmem:[#allocation27_spill] sm:$0xff]  ;;  %v3298_v7 = vld [vmem:[#allocation29_spill] sm:$0xff] }
 0x13a   :  { %v491_v16 = vmul.f32 %v1921_v1, %v325_v6  ;;  %v1923_v63 = vpop.eup %1922  ;;  %v3297_v6 = vld [vmem:[#allocation28_spill] sm:$0xff]  ;;  %v3299_v1 = vld [vmem:[#allocation30_spill] sm:$0xff] }
 0x13c   :  { %v2570_v0 = vadd.f32 %v492_v14, %v491_v16  ;;  %v3301_v14 = vld [vmem:[#allocation32_spill] sm:$0xff]  ;;  %v3302_v16 = vld [vmem:[#allocation33_spill] sm:$0xff] }
 0x13e   :  { %1924 = vtanh.f32 %v2570_v0 }
 0x14b   :  { %v1925_v4 = vpop.eup %1924 }
 0x14c   :  { %v495_v9 = vmul.f32 %v1925_v4, %v1923_v63  ;;  %v3303_v63 = vld [vmem:[#allocation34_spill] sm:$0xff]  ;;  %v3304_v4 = vld [vmem:[#allocation35_spill] sm:$0xff] }
 0x14e   :  { %496 = vst [vmem:[#allocation2] sm:$0x1] %v495_v9  ;;  %562 = vmatmul.mubr.f32.vlgmr.msra.gmra.mxu0 %v495_v9  ;;  %633 = vmatmul.mubr.f32.vlgmr.msra.gmra.mxu1 %v495_v9  ;;  %v3305_v9 = vld [vmem:[#allocation36_spill] sm:$0xff] }
 0x14f   :  { %687 = vmatpush1.msra.mxu0 %v2291_v21  ;;  %758 = vmatpush1.msra.mxu1 %v2293_v22 }
 0x150   :  { %688 = vmatprep.subr.mxu0 %v2296_v23  ;;  %759 = vmatprep.subr.mxu1 %v2298_v24 }
 0x151   :  { %689 = vmatpush1.msra.mxu0 %v2301_v25  ;;  %760 = vmatpush1.msra.mxu1 %v2303_v26 }
 0x152   :  { %690 = vmatprep.subr.mxu0 %v2307_v27  ;;  %761 = vmatprep.subr.mxu1 %v2309_v28 }
 0x153   :  { %691 = vmatpush1.msra.mxu0 %v2313_v29  ;;  %762 = vmatpush1.msra.mxu1 %v2315_v30 }
 0x154   :  { %692 = vmatprep.subr.mxu0 %v2319_v31  ;;  %763 = vmatprep.subr.mxu1 %v2321_v32 }
 0x155   :  { %693 = vmatpush1.msra.mxu0 %v2325_v33  ;;  %764 = vmatpush1.msra.mxu1 %v2327_v34 }
 0x156   :  { %694 = vmatprep.subr.mxu0 %v2331_v35  ;;  %765 = vmatprep.subr.mxu1 %v2333_v36 }
 0x157   :  { %695 = vmatpush1.msra.mxu0 %v2337_v37  ;;  %766 = vmatpush1.msra.mxu1 %v2339_v38 }
 0x158   :  { %696 = vmatprep.subr.mxu0 %v2343_v39  ;;  %767 = vmatprep.subr.mxu1 %v2345_v40 }
 0x159   :  { %697 = vmatpush1.msra.mxu0 %v2349_v41  ;;  %768 = vmatpush1.msra.mxu1 %v2351_v42 }
 0x15a   :  { %698 = vmatprep.subr.mxu0 %v2355_v43  ;;  %769 = vmatprep.subr.mxu1 %v2357_v44 }
 0x15b   :  { %699 = vmatpush1.msra.mxu0 %v2361_v45  ;;  %770 = vmatpush1.msra.mxu1 %v2363_v46 }
 0x15c   :  { %700 = vmatprep.subr.mxu0 %v2367_v47  ;;  %771 = vmatprep.subr.mxu1 %v2369_v48 }
 0x15d   :  { %701 = vmatpush1.msra.mxu0 %v2373_v49  ;;  %772 = vmatpush1.msra.mxu1 %v2375_v50 }
 0x15e   :  { %702 = vmatprep.subr.mxu0 %v2379_v51  ;;  %773 = vmatprep.subr.mxu1 %v2381_v52 }
 0x15f   :  { %703 = vmatpush1.msra.mxu0 %v2385_v53  ;;  %774 = vmatpush1.msra.mxu1 %v2387_v54 }
 0x160   :  { %704 = vmatprep.subr.mxu0 %v2391_v55  ;;  %775 = vmatprep.subr.mxu1 %v2393_v56 }
 0x161   :  { %705 = vmatpush1.msra.mxu0 %v2397_v57  ;;  %776 = vmatpush1.msra.mxu1 %v2399_v58 }
 0x162   :  { %706 = vmatprep.subr.mxu0 %v2403_v59  ;;  %777 = vmatprep.subr.mxu1 %v2405_v60 }
 0x163   :  { %707 = vmatpush1.msra.mxu0 %v2409_v61  ;;  %778 = vmatpush1.msra.mxu1 %v2411_v62 }
 0x164   :  { %708 = vmatprep.subr.mxu0 %v3288_v17  ;;  %779 = vmatprep.subr.mxu1 %v3289_v15 }
 0x165   :  { %709 = vmatpush1.msra.mxu0 %v3290_v10  ;;  %780 = vmatpush1.msra.mxu1 %v3291_v12 }
 0x166   :  { %710 = vmatprep.subr.mxu0 %v3292_v20  ;;  %781 = vmatprep.subr.mxu1 %v3293_v13 }
 0x167   :  { %711 = vmatpush1.msra.mxu0 %v3294_v5  ;;  %782 = vmatpush1.msra.mxu1 %v3295_v19  ;;  %v3306_v19 = vld [vmem:[#allocation37_spill] sm:$0xff] }
 0x168   :  { %712 = vmatprep.subr.mxu0 %v3296_v3  ;;  %783 = vmatprep.subr.mxu1 %v3297_v6  ;;  %v3307_v3 = vmov 0.0   ;;  %v3308_v6 = vld [vmem:[#allocation38_spill] sm:$0xff] }
 0x169   :  { %713 = vmatpush1.msra.mxu0 %v3298_v7  ;;  %784 = vmatpush1.msra.mxu1 %v3299_v1  ;;  %v3309_v1 = vld [vmem:[#allocation17_spill] sm:$0xff] }
 0x16a   :  { %714 = vmatprep.subr.mxu0 %v3300_v2  ;;  %785 = vmatprep.subr.mxu1 %v3301_v14  ;;  %v3310_v2 = vld [vmem:[#allocation18_spill] sm:$0xff] }
 0x16b   :  { %715 = vmatpush1.msra.mxu0 %v3302_v16  ;;  %786 = vmatpush1.msra.mxu1 %v3303_v63  ;;  %v3311_v63 = vld [vmem:[#allocation39_spill] sm:$0xff] }
 0x16c   :  { %716 = vmatprep.subr.mxu0 %v3304_v4  ;;  %787 = vmatprep.subr.mxu1 %v3305_v9 }
 0x16d   :  { %717 = vmatpush1.msra.mxu0 %v3306_v19  ;;  %750 = vmatprep.mubr.f32.mxu0 %v3307_v3 }
 0x16e   :  { %788 = vmatpush1.msra.mxu1 %v3308_v6  ;;  %821 = vmatprep.mubr.f32.mxu1 %v3307_v3 }
 0x16f   :  { %875 = vmatprep.subr.mxu0 %v3309_v1  ;;  %946 = vmatprep.subr.mxu1 %v3310_v2 }
 0x20e   :  { %v563_v14 = vpop.f32.mrf.mxu0  ;;  %v634_v4 = vpop.f32.mrf.mxu1 }
 0x20f   :  { %v643_v16 = vrot.slane %v563_v14, 7  ;;  %v645_v1 = vrot.slane %v634_v4, 7 }
 0x210   :  { %v565_v7 = vpop.f32.mrf.mxu0  ;;  %v636_v12 = vpop.f32.mrf.mxu1 }
 0x211   :  { %v651_v5 = vadd.f32 %v643_v16, %v3311_v63  ;;  %v644_v13 = vrot.slane %v565_v7, 7  ;;  %v646_v6 = vrot.slane %v636_v12, 7  ;;  %v653_v14 = vadd.f32 %v645_v1, %v2564_v11 }
 0x213   :  { %v1879_v9 = vmul.f32 -1.442695, %v651_v5  ;;  %v652_v19 = vadd.f32 %v644_v13, %v2557_v8  ;;  %v654_v3 = vadd.f32 %v646_v6, %v2561_v18 }
 0x215   :  { %1926 = vpow2.f32 %v1879_v9  ;;  %v1880_v20 = vmul.f32 -1.442695, %v652_v19  ;;  %v1881_v10 = vmul.f32 -1.442695, %v654_v3  ;;  %v3314_v9 = vld [vmem:[#allocation21_spill] sm:$0xff] }
 0x217   :  { %1928 = vpow2.f32 %v1880_v20  ;;  %v675_v20 = vrot.slane %v2570_v0, 7  ;;  %v3312_v0 = vld [vmem:[#allocation19_spill] sm:$0xff] }
 0x218   :  { %1930 = vpow2.f32 %v1881_v10 }
 0x222   :  { %v1927_v2 = vpop.eup %1926 }
 0x223   :  { %v658_v15 = vadd.f32 1.0, %v1927_v2  ;;  %v3313_v2 = vld [vmem:[#allocation20_spill] sm:$0xff] }
 0x224   :  { %v1929_v17 = vpop.eup %1928 }
 0x225   :  { %1932 = vrcp.f32 %v658_v15  ;;  %v664_v7 = vadd.f32 1.0, %v1929_v17  ;;  %v1931_v13 = vpop.eup %1930 }
 0x226   :  { %1934 = vtanh.f32 %v653_v14  ;;  %v671_v16 = vadd.f32 1.0, %v1931_v13  ;;  %v3315_v14 = vld [vmem:[#allocation22_spill] sm:$0xff]  ;;  %v3317_v13 = vld [vmem:[#allocation24_spill] sm:$0xff] }
 0x227   :  { %1936 = vrcp.f32 %v664_v7  ;;  %v3316_v7 = vld [vmem:[#allocation23_spill] sm:$0xff] }
 0x228   :  { %1938 = vrcp.f32 %v671_v16  ;;  %v3322_v16 = vld [vmem:[#allocation29_spill] sm:$0xff] }
 0x232   :  { %v1933_v5 = vpop.eup %1932 }
 0x233   :  { %v1935_v19 = vpop.eup %1934 }
 0x234   :  { %v1937_v12 = vpop.eup %1936  ;;  %v678_v6 = vmul.f32 %v1935_v19, %v1933_v5  ;;  %v3318_v5 = vld [vmem:[#allocation25_spill] sm:$0xff]  ;;  %v3319_v19 = vld [vmem:[#allocation26_spill] sm:$0xff] }
 0x235   :  { %v677_v4 = vmul.f32 %v1937_v12, %v675_v20  ;;  %v1939_v1 = vpop.eup %1938  ;;  %v3320_v20 = vld [vmem:[#allocation27_spill] sm:$0xff]  ;;  %v3321_v12 = vld [vmem:[#allocation28_spill] sm:$0xff] }
 0x237   :  { %v2644_v3 = vadd.f32 %v678_v6, %v677_v4  ;;  %v3323_v6 = vld [vmem:[#allocation30_spill] sm:$0xff]  ;;  %v3324_v4 = vld [vmem:[#allocation31_spill] sm:$0xff] }
 0x239   :  { %1940 = vtanh.f32 %v2644_v3 }
 0x246   :  { %v1941_v10 = vpop.eup %1940 }
 0x247   :  { %v681_v15 = vmul.f32 %v1941_v10, %v1939_v1  ;;  %v3325_v1 = vld [vmem:[#allocation32_spill] sm:$0xff]  ;;  %v3326_v10 = vld [vmem:[#allocation33_spill] sm:$0xff] }
 0x249   :  { %682 = vst [vmem:[#allocation2] sm:$0x2] %v681_v15  ;;  %v684_v17 = vrot.slane %v681_v15, 1  ;;  %v3327_v15 = vld [vmem:[#allocation34_spill] sm:$0xff] }
 0x24b   :  { %751 = vmatmul.mubr.f32.vlgmr.msra.gmra.mxu0 %v684_v17  ;;  %822 = vmatmul.mubr.f32.vlgmr.msra.gmra.mxu1 %v684_v17  ;;  %v3328_v17 = vld [vmem:[#allocation35_spill] sm:$0xff] }
 0x24c   :  { %876 = vmatpush1.msra.mxu0 %v2291_v21  ;;  %947 = vmatpush1.msra.mxu1 %v2293_v22 }
 0x24d   :  { %877 = vmatprep.subr.mxu0 %v2296_v23  ;;  %948 = vmatprep.subr.mxu1 %v2298_v24 }
 0x24e   :  { %878 = vmatpush1.msra.mxu0 %v2301_v25  ;;  %949 = vmatpush1.msra.mxu1 %v2303_v26 }
 0x24f   :  { %879 = vmatprep.subr.mxu0 %v2307_v27  ;;  %950 = vmatprep.subr.mxu1 %v2309_v28 }
 0x250   :  { %880 = vmatpush1.msra.mxu0 %v2313_v29  ;;  %951 = vmatpush1.msra.mxu1 %v2315_v30 }
 0x251   :  { %881 = vmatprep.subr.mxu0 %v2319_v31  ;;  %952 = vmatprep.subr.mxu1 %v2321_v32 }
 0x252   :  { %882 = vmatpush1.msra.mxu0 %v2325_v33  ;;  %953 = vmatpush1.msra.mxu1 %v2327_v34 }
 0x253   :  { %883 = vmatprep.subr.mxu0 %v2331_v35  ;;  %954 = vmatprep.subr.mxu1 %v2333_v36 }
 0x254   :  { %884 = vmatpush1.msra.mxu0 %v2337_v37  ;;  %955 = vmatpush1.msra.mxu1 %v2339_v38 }
 0x255   :  { %885 = vmatprep.subr.mxu0 %v2343_v39  ;;  %956 = vmatprep.subr.mxu1 %v2345_v40 }
 0x256   :  { %886 = vmatpush1.msra.mxu0 %v2349_v41  ;;  %957 = vmatpush1.msra.mxu1 %v2351_v42 }
 0x257   :  { %887 = vmatprep.subr.mxu0 %v2355_v43  ;;  %958 = vmatprep.subr.mxu1 %v2357_v44 }
 0x258   :  { %888 = vmatpush1.msra.mxu0 %v2361_v45  ;;  %959 = vmatpush1.msra.mxu1 %v2363_v46 }
 0x259   :  { %889 = vmatprep.subr.mxu0 %v2367_v47  ;;  %960 = vmatprep.subr.mxu1 %v2369_v48 }
 0x25a   :  { %890 = vmatpush1.msra.mxu0 %v2373_v49  ;;  %961 = vmatpush1.msra.mxu1 %v2375_v50 }
 0x25b   :  { %891 = vmatprep.subr.mxu0 %v2379_v51  ;;  %962 = vmatprep.subr.mxu1 %v2381_v52 }
 0x25c   :  { %892 = vmatpush1.msra.mxu0 %v2385_v53  ;;  %963 = vmatpush1.msra.mxu1 %v2387_v54 }
 0x25d   :  { %893 = vmatprep.subr.mxu0 %v2391_v55  ;;  %964 = vmatprep.subr.mxu1 %v2393_v56 }
 0x25e   :  { %894 = vmatpush1.msra.mxu0 %v2397_v57  ;;  %965 = vmatpush1.msra.mxu1 %v2399_v58 }
 0x25f   :  { %895 = vmatprep.subr.mxu0 %v2403_v59  ;;  %966 = vmatprep.subr.mxu1 %v2405_v60 }
 0x260   :  { %896 = vmatpush1.msra.mxu0 %v2409_v61  ;;  %967 = vmatpush1.msra.mxu1 %v2411_v62 }
 0x261   :  { %897 = vmatprep.subr.mxu0 %v3312_v0  ;;  %968 = vmatprep.subr.mxu1 %v3313_v2 }
 0x262   :  { %898 = vmatpush1.msra.mxu0 %v3314_v9  ;;  %969 = vmatpush1.msra.mxu1 %v3315_v14 }
 0x263   :  { %899 = vmatprep.subr.mxu0 %v3316_v7  ;;  %970 = vmatprep.subr.mxu1 %v3317_v13 }
 0x264   :  { %900 = vmatpush1.msra.mxu0 %v3318_v5  ;;  %971 = vmatpush1.msra.mxu1 %v3319_v19  ;;  %v3329_v5 = vld [vmem:[#allocation36_spill] sm:$0xff]  ;;  %v3330_v19 = vld [vmem:[#allocation37_spill] sm:$0xff] }
 0x265   :  { %901 = vmatprep.subr.mxu0 %v3320_v20  ;;  %972 = vmatprep.subr.mxu1 %v3321_v12  ;;  %v3331_v20 = vmov 0.0   ;;  %v3332_v12 = vld [vmem:[#allocation38_spill] sm:$0xff] }
 0x266   :  { %902 = vmatpush1.msra.mxu0 %v3322_v16  ;;  %973 = vmatpush1.msra.mxu1 %v3323_v6  ;;  %v3333_v6 = vld [vmem:[#allocation17_spill] sm:$0xff] }
 0x267   :  { %903 = vmatprep.subr.mxu0 %v3324_v4  ;;  %974 = vmatprep.subr.mxu1 %v3325_v1  ;;  %v3334_v4 = vld [vmem:[#allocation18_spill] sm:$0xff] }
 0x268   :  { %904 = vmatpush1.msra.mxu0 %v3326_v10  ;;  %975 = vmatpush1.msra.mxu1 %v3327_v15 }
 0x269   :  { %905 = vmatprep.subr.mxu0 %v3328_v17  ;;  %976 = vmatprep.subr.mxu1 %v3329_v5 }
 0x26a   :  { %906 = vmatpush1.msra.mxu0 %v3330_v19  ;;  %939 = vmatprep.mubr.f32.mxu0 %v3331_v20 }
 0x26b   :  { %977 = vmatpush1.msra.mxu1 %v3332_v12  ;;  %1010 = vmatprep.mubr.f32.mxu1 %v3331_v20 }
 0x26c   :  { %1064 = vmatprep.subr.mxu0 %v3333_v6  ;;  %1135 = vmatprep.subr.mxu1 %v3334_v4 }
 0x30b   :  { %v752_v1 = vpop.f32.mrf.mxu0  ;;  %v823_v17 = vpop.f32.mrf.mxu1 }
 0x30c   :  { %v832_v10 = vrot.slane %v752_v1, 6  ;;  %v834_v6 = vrot.slane %v823_v17, 6 }
 0x30d   :  { %v754_v16 = vpop.f32.mrf.mxu0  ;;  %v825_v14 = vpop.f32.mrf.mxu1 }
 0x30e   :  { %v840_v15 = vadd.f32 %v832_v10, %v3311_v63  ;;  %v833_v13 = vrot.slane %v754_v16, 6  ;;  %v835_v12 = vrot.slane %v825_v14, 6  ;;  %v842_v1 = vadd.f32 %v834_v6, %v2564_v11 }
 0x310   :  { %v1882_v5 = vmul.f32 -1.442695, %v840_v15  ;;  %v841_v19 = vadd.f32 %v833_v13, %v2557_v8  ;;  %v843_v20 = vadd.f32 %v835_v12, %v2561_v18 }
 0x312   :  { %1942 = vpow2.f32 %v1882_v5  ;;  %v1883_v7 = vmul.f32 -1.442695, %v841_v19  ;;  %v1884_v9 = vmul.f32 -1.442695, %v843_v20 }
 0x314   :  { %1944 = vpow2.f32 %v1883_v7  ;;  %v864_v7 = vrot.slane %v2644_v3, 7 }
 0x315   :  { %1946 = vpow2.f32 %v1884_v9 }
 0x31f   :  { %v1943_v4 = vpop.eup %1942 }
 0x320   :  { %v847_v2 = vadd.f32 1.0, %v1943_v4 }
 0x321   :  { %v1945_v0 = vpop.eup %1944 }
 0x322   :  { %1948 = vrcp.f32 %v847_v2  ;;  %v853_v16 = vadd.f32 1.0, %v1945_v0  ;;  %v1947_v13 = vpop.eup %1946 }
 0x323   :  { %1950 = vtanh.f32 %v842_v1  ;;  %v860_v10 = vadd.f32 1.0, %v1947_v13 }
 0x324   :  { %1952 = vrcp.f32 %v853_v16 }
 0x325   :  { %1954 = vrcp.f32 %v860_v10 }
 0x32f   :  { %v1949_v5 = vpop.eup %1948 }
 0x330   :  { %v1951_v19 = vpop.eup %1950 }
 0x331   :  { %v1953_v14 = vpop.eup %1952  ;;  %v867_v12 = vmul.f32 %v1951_v19, %v1949_v5 }
 0x332   :  { %v866_v15 = vmul.f32 %v1953_v14, %v864_v7  ;;  %v1955_v17 = vpop.eup %1954 }
 0x334   :  { %v2718_v20 = vadd.f32 %v867_v12, %v866_v15 }
 0x336   :  { %1956 = vtanh.f32 %v2718_v20  ;;  %v1053_v1 = vrot.slane %v2718_v20, 7  ;;  %v2802_v20 = vld [vmem:[#allocation9 + $0x1f0] sm:$0xff] }
 0x343   :  { %v1957_v9 = vpop.eup %1956 }
 0x344   :  { %v870_v2 = vmul.f32 %v1957_v9, %v1955_v17  ;;  %v2799_v17 = vld [vmem:[#allocation9 + $0x1e0] sm:$0xff]  ;;  %v2805_v9 = vld [vmem:[#allocation9 + $0x1c8] sm:$0xff] }
 0x346   :  { %871 = vst [vmem:[#allocation2] sm:$0x4] %v870_v2  ;;  %v873_v0 = vrot.slane %v870_v2, 2  ;;  %v2808_v2 = vld [vmem:[#allocation9 + $0x1d8] sm:$0xff] }
 0x348   :  { %940 = vmatmul.mubr.f32.vlgmr.msra.gmra.mxu0 %v873_v0  ;;  %1011 = vmatmul.mubr.f32.vlgmr.msra.gmra.mxu1 %v873_v0  ;;  %v2811_v0 = vld [vmem:[#allocation9 + $0x1c0] sm:$0xff] }
 0x349   :  { %1065 = vmatpush1.msra.mxu0 %v2291_v21  ;;  %1136 = vmatpush1.msra.mxu1 %v2293_v22  ;;  %v3335_v21 = vld [vmem:[#allocation19_spill] sm:$0xff]  ;;  %v3336_v22 = vld [vmem:[#allocation20_spill] sm:$0xff] }
 0x34a   :  { %1066 = vmatprep.subr.mxu0 %v2296_v23  ;;  %1137 = vmatprep.subr.mxu1 %v2298_v24  ;;  %v3337_v23 = vld [vmem:[#allocation21_spill] sm:$0xff]  ;;  %v3338_v24 = vld [vmem:[#allocation22_spill] sm:$0xff] }
 0x34b   :  { %1067 = vmatpush1.msra.mxu0 %v2301_v25  ;;  %1138 = vmatpush1.msra.mxu1 %v2303_v26  ;;  %v3339_v25 = vld [vmem:[#allocation23_spill] sm:$0xff]  ;;  %v3340_v26 = vld [vmem:[#allocation24_spill] sm:$0xff] }
 0x34c   :  { %1068 = vmatprep.subr.mxu0 %v2307_v27  ;;  %1139 = vmatprep.subr.mxu1 %v2309_v28  ;;  %v3341_v27 = vld [vmem:[#allocation25_spill] sm:$0xff]  ;;  %v3342_v28 = vld [vmem:[#allocation26_spill] sm:$0xff] }
 0x34d   :  { %1069 = vmatpush1.msra.mxu0 %v2313_v29  ;;  %1140 = vmatpush1.msra.mxu1 %v2315_v30  ;;  %v3343_v29 = vld [vmem:[#allocation27_spill] sm:$0xff]  ;;  %v3344_v30 = vld [vmem:[#allocation28_spill] sm:$0xff] }
 0x34e   :  { %1070 = vmatprep.subr.mxu0 %v2319_v31  ;;  %1141 = vmatprep.subr.mxu1 %v2321_v32  ;;  %v3345_v31 = vld [vmem:[#allocation29_spill] sm:$0xff]  ;;  %v3346_v32 = vld [vmem:[#allocation30_spill] sm:$0xff] }
 0x34f   :  { %1071 = vmatpush1.msra.mxu0 %v2325_v33  ;;  %1142 = vmatpush1.msra.mxu1 %v2327_v34  ;;  %v3347_v33 = vld [vmem:[#allocation31_spill] sm:$0xff]  ;;  %v3348_v34 = vld [vmem:[#allocation32_spill] sm:$0xff] }
 0x350   :  { %1072 = vmatprep.subr.mxu0 %v2331_v35  ;;  %1143 = vmatprep.subr.mxu1 %v2333_v36  ;;  %v3349_v35 = vld [vmem:[#allocation33_spill] sm:$0xff]  ;;  %v3350_v36 = vld [vmem:[#allocation34_spill] sm:$0xff] }
 0x351   :  { %1073 = vmatpush1.msra.mxu0 %v2337_v37  ;;  %1144 = vmatpush1.msra.mxu1 %v2339_v38  ;;  %v3351_v37 = vld [vmem:[#allocation35_spill] sm:$0xff]  ;;  %v3352_v38 = vld [vmem:[#allocation36_spill] sm:$0xff] }
 0x352   :  { %1074 = vmatprep.subr.mxu0 %v2343_v39  ;;  %1145 = vmatprep.subr.mxu1 %v2345_v40  ;;  %v3353_v39 = vld [vmem:[#allocation37_spill] sm:$0xff]  ;;  %v3354_v40 = vmov 0.0  }
 0x353   :  { %1075 = vmatpush1.msra.mxu0 %v2349_v41  ;;  %1146 = vmatpush1.msra.mxu1 %v2351_v42  ;;  %v3355_v41 = vld [vmem:[#allocation38_spill] sm:$0xff] }
 0x354   :  { %1076 = vmatprep.subr.mxu0 %v2355_v43  ;;  %1147 = vmatprep.subr.mxu1 %v2357_v44  ;;  %v2785_v42 = vld [vmem:[#allocation9 + $0x1e8] sm:$0xff]  ;;  %v2788_v43 = vld [vmem:[#allocation9 + $0x1f8] sm:$0xff] }
 0x355   :  { %1077 = vmatpush1.msra.mxu0 %v2361_v45  ;;  %1148 = vmatpush1.msra.mxu1 %v2363_v46  ;;  %3356 = vst [vmem:[#allocation39_spill] sm:$0xff] %v2785_v42  ;;  %3357 = vst [vmem:[#allocation17_spill] sm:$0xff] %v2788_v43 }
 0x356   :  { %1078 = vmatprep.subr.mxu0 %v2367_v47  ;;  %1149 = vmatprep.subr.mxu1 %v2369_v48 }
 0x357   :  { %1079 = vmatpush1.msra.mxu0 %v2373_v49  ;;  %1150 = vmatpush1.msra.mxu1 %v2375_v50 }
 0x358   :  { %1080 = vmatprep.subr.mxu0 %v2379_v51  ;;  %1151 = vmatprep.subr.mxu1 %v2381_v52 }
 0x359   :  { %1081 = vmatpush1.msra.mxu0 %v2385_v53  ;;  %1152 = vmatpush1.msra.mxu1 %v2387_v54 }
 0x35a   :  { %1082 = vmatprep.subr.mxu0 %v2391_v55  ;;  %1153 = vmatprep.subr.mxu1 %v2393_v56 }
 0x35b   :  { %1083 = vmatpush1.msra.mxu0 %v2397_v57  ;;  %1154 = vmatpush1.msra.mxu1 %v2399_v58 }
 0x35c   :  { %1084 = vmatprep.subr.mxu0 %v2403_v59  ;;  %1155 = vmatprep.subr.mxu1 %v2405_v60 }
 0x35d   :  { %1085 = vmatpush1.msra.mxu0 %v2409_v61  ;;  %1156 = vmatpush1.msra.mxu1 %v2411_v62 }
 0x35e   :  { %1086 = vmatprep.subr.mxu0 %v3335_v21  ;;  %1157 = vmatprep.subr.mxu1 %v3336_v22  ;;  %v2814_v21 = vld [vmem:[#allocation9 + $0x1d0] sm:$0xff]  ;;  %v2817_v22 = vld [vmem:[#allocation9 + $0x1a8] sm:$0xff] }
 0x35f   :  { %1087 = vmatpush1.msra.mxu0 %v3337_v23  ;;  %1158 = vmatpush1.msra.mxu1 %v3338_v24  ;;  %v2820_v23 = vld [vmem:[#allocation9 + $0x1b8] sm:$0xff]  ;;  %v2823_v24 = vld [vmem:[#allocation9 + $0x1a0] sm:$0xff] }
 0x360   :  { %1088 = vmatprep.subr.mxu0 %v3339_v25  ;;  %1159 = vmatprep.subr.mxu1 %v3340_v26  ;;  %v2826_v25 = vld [vmem:[#allocation9 + $0x1b0] sm:$0xff]  ;;  %v2829_v26 = vld [vmem:[#allocation9 + $0x188] sm:$0xff] }
 0x361   :  { %1089 = vmatpush1.msra.mxu0 %v3341_v27  ;;  %1160 = vmatpush1.msra.mxu1 %v3342_v28  ;;  %v2832_v27 = vld [vmem:[#allocation9 + $0x198] sm:$0xff]  ;;  %v2835_v28 = vld [vmem:[#allocation9 + $0x180] sm:$0xff] }
 0x362   :  { %1090 = vmatprep.subr.mxu0 %v3343_v29  ;;  %1161 = vmatprep.subr.mxu1 %v3344_v30  ;;  %v2838_v29 = vld [vmem:[#allocation9 + $0x190] sm:$0xff]  ;;  %v2841_v30 = vld [vmem:[#allocation9 + $0x168] sm:$0xff] }
 0x363   :  { %1091 = vmatpush1.msra.mxu0 %v3345_v31  ;;  %1162 = vmatpush1.msra.mxu1 %v3346_v32  ;;  %v2844_v31 = vld [vmem:[#allocation9 + $0x178] sm:$0xff]  ;;  %v2847_v32 = vld [vmem:[#allocation9 + $0x160] sm:$0xff] }
 0x364   :  { %1092 = vmatprep.subr.mxu0 %v3347_v33  ;;  %1163 = vmatprep.subr.mxu1 %v3348_v34  ;;  %v2850_v33 = vld [vmem:[#allocation9 + $0x170] sm:$0xff]  ;;  %v2853_v34 = vld [vmem:[#allocation9 + $0x148] sm:$0xff] }
 0x365   :  { %1093 = vmatpush1.msra.mxu0 %v3349_v35  ;;  %1164 = vmatpush1.msra.mxu1 %v3350_v36  ;;  %v2856_v35 = vld [vmem:[#allocation9 + $0x158] sm:$0xff]  ;;  %v2859_v36 = vld [vmem:[#allocation9 + $0x140] sm:$0xff] }
 0x366   :  { %1094 = vmatprep.subr.mxu0 %v3351_v37  ;;  %1165 = vmatprep.subr.mxu1 %v3352_v38  ;;  %v2862_v37 = vld [vmem:[#allocation9 + $0x150] sm:$0xff]  ;;  %v2865_v38 = vld [vmem:[#allocation9 + $0x128] sm:$0xff] }
 0x367   :  { %1095 = vmatpush1.msra.mxu0 %v3353_v39  ;;  %1128 = vmatprep.mubr.f32.mxu0 %v3354_v40  ;;  %v2868_v39 = vld [vmem:[#allocation9 + $0x138] sm:$0xff] }
 0x368   :  { %1166 = vmatpush1.msra.mxu1 %v3355_v41  ;;  %1199 = vmatprep.mubr.f32.mxu1 %v3354_v40  ;;  %v2871_v41 = vld [vmem:[#allocation9 + $0x120] sm:$0xff] }
 0x369   :  { %1253 = vmatprep.subr.mxu0 %v2785_v42  ;;  %1324 = vmatprep.subr.mxu1 %v2788_v43 }
 0x408   :  { %v941_v44 = vpop.f32.mrf.mxu0  ;;  %v1012_v48 = vpop.f32.mrf.mxu1 }
 0x409   :  { %v1021_v45 = vrot.slane %v941_v44, 5  ;;  %v1023_v56 = vrot.slane %v1012_v48, 5  ;;  %v2874_v44 = vld [vmem:[#allocation9 + $0x130] sm:$0xff] }
 0x40a   :  { %v943_v46 = vpop.f32.mrf.mxu0  ;;  %v1014_v53 = vpop.f32.mrf.mxu1  ;;  %v2886_v48 = vld [vmem:[#allocation9 + $0x110] sm:$0xff] }
 0x40b   :  { %v1029_v47 = vadd.f32 %v1021_v45, %v3311_v63  ;;  %v1022_v49 = vrot.slane %v943_v46, 5  ;;  %v1024_v54 = vrot.slane %v1014_v53, 5  ;;  %v1031_v59 = vadd.f32 %v1023_v56, %v2564_v11  ;;  %v2877_v45 = vld [vmem:[#allocation9 + $0x108] sm:$0xff]  ;;  %v2880_v46 = vld [vmem:[#allocation9 + $0x118] sm:$0xff]  ;;  %v2910_v56 = vld [vmem:[#allocation9 + $0xd0] sm:$0xff] }
 0x40c   :  { %v2901_v53 = vld [vmem:[#allocation9 + $0xc8] sm:$0xff] }
 0x40d   :  { %v1885_v50 = vmul.f32 -1.442695, %v1029_v47  ;;  %v1030_v51 = vadd.f32 %v1022_v49, %v2557_v8  ;;  %v1032_v55 = vadd.f32 %v1024_v54, %v2561_v18  ;;  %v2883_v47 = vld [vmem:[#allocation9 + $0x100] sm:$0xff]  ;;  %v2889_v49 = vld [vmem:[#allocation9 + $0xe8] sm:$0xff]  ;;  %v2904_v54 = vld [vmem:[#allocation9 + $0xd8] sm:$0xff] }
 0x40f   :  { %1958 = vpow2.f32 %v1885_v50  ;;  %v1886_v52 = vmul.f32 -1.442695, %v1030_v51  ;;  %v1887_v57 = vmul.f32 -1.442695, %v1032_v55  ;;  %v2892_v50 = vld [vmem:[#allocation9 + $0xf8] sm:$0xff]  ;;  %v2895_v51 = vld [vmem:[#allocation9 + $0xe0] sm:$0xff] }
 0x410   :  { %v2907_v55 = vld [vmem:[#allocation9 + $0xc0] sm:$0xff] }
 0x411   :  { %1960 = vpow2.f32 %v1886_v52  ;;  %v2898_v52 = vld [vmem:[#allocation9 + $0xf0] sm:$0xff] }
 0x412   :  { %1962 = vpow2.f32 %v1887_v57  ;;  %v2913_v57 = vld [vmem:[#allocation9 + $0xa8] sm:$0xff] }
 0x41c   :  { %v1959_v58 = vpop.eup %1958 }
 0x41d   :  { %v1036_v60 = vadd.f32 1.0, %v1959_v58  ;;  %v2916_v58 = vld [vmem:[#allocation9 + $0xb8] sm:$0xff] }
 0x41e   :  { %v1961_v61 = vpop.eup %1960 }
 0x41f   :  { %1964 = vrcp.f32 %v1036_v60  ;;  %v1042_v62 = vadd.f32 1.0, %v1961_v61  ;;  %v1963_v3 = vpop.eup %1962  ;;  %v2922_v60 = vld [vmem:[#allocation9 + $0xb0] sm:$0xff]  ;;  %v2925_v61 = vld [vmem:[#allocation9 + $0x88] sm:$0xff] }
 0x420   :  { %1966 = vtanh.f32 %v1031_v59  ;;  %v1049_v13 = vadd.f32 1.0, %v1963_v3  ;;  %v2919_v59 = vld [vmem:[#allocation9 + $0xa0] sm:$0xff]  ;;  %3358 = vst [vmem:[#allocation18_spill] sm:$0xff] %v2925_v61 }
 0x421   :  { %1968 = vrcp.f32 %v1042_v62  ;;  %v2928_v62 = vld [vmem:[#allocation9 + $0x98] sm:$0xff]  ;;  %v2931_v3 = vld [vmem:[#allocation9 + $0x80] sm:$0xff] }
 0x422   :  { %1970 = vrcp.f32 %v1049_v13  ;;  %3359 = vst [vmem:[#allocation19_spill] sm:$0xff] %v2928_v62  ;;  %3360 = vst [vmem:[#allocation20_spill] sm:$0xff] %v2931_v3  ;;  %v2946_v13 = vld [vmem:[#allocation9 + $0x70] sm:$0xff] }
 0x423   :  { %3365 = vst [vmem:[#allocation25_spill] sm:$0xff] %v2946_v13 }
 0x42c   :  { %v1965_v6 = vpop.eup %1964 }
 0x42d   :  { %v1967_v4 = vpop.eup %1966 }
 0x42e   :  { %v1969_v16 = vpop.eup %1968  ;;  %v1056_v5 = vmul.f32 %v1967_v4, %v1965_v6  ;;  %v2934_v6 = vld [vmem:[#allocation9 + $0x90] sm:$0xff]  ;;  %v2937_v4 = vld [vmem:[#allocation9 + $0x68] sm:$0xff] }
 0x42f   :  { %v1055_v19 = vmul.f32 %v1969_v16, %v1053_v1  ;;  %v1971_v14 = vpop.eup %1970  ;;  %3361 = vst [vmem:[#allocation21_spill] sm:$0xff] %v2934_v6  ;;  %3362 = vst [vmem:[#allocation22_spill] sm:$0xff] %v2937_v4  ;;  %v2940_v1 = vld [vmem:[#allocation9 + $0x78] sm:$0xff]  ;;  %v2943_v16 = vld [vmem:[#allocation9 + $0x60] sm:$0xff] }
 0x430   :  { %3363 = vst [vmem:[#allocation23_spill] sm:$0xff] %v2940_v1  ;;  %3364 = vst [vmem:[#allocation24_spill] sm:$0xff] %v2943_v16 }
 0x431   :  { %v2796_v7 = vadd.f32 %v1056_v5, %v1055_v19  ;;  %v2949_v5 = vld [vmem:[#allocation9 + $0x48] sm:$0xff]  ;;  %v2952_v19 = vld [vmem:[#allocation9 + $0x58] sm:$0xff] }
 0x432   :  { %3366 = vst [vmem:[#allocation26_spill] sm:$0xff] %v2949_v5  ;;  %3367 = vst [vmem:[#allocation27_spill] sm:$0xff] %v2952_v19 }
 0x433   :  { %1972 = vtanh.f32 %v2796_v7 }
 0x440   :  { %v1973_v10 = vpop.eup %1972 }
 0x441   :  { %v1059_v12 = vmul.f32 %v1973_v10, %v1971_v14  ;;  %v2955_v14 = vld [vmem:[#allocation9 + $0x40] sm:$0xff]  ;;  %v2958_v10 = vld [vmem:[#allocation9 + $0x50] sm:$0xff] }
 0x442   :  { %3368 = vst [vmem:[#allocation28_spill] sm:$0xff] %v2955_v14  ;;  %3369 = vst [vmem:[#allocation29_spill] sm:$0xff] %v2958_v10 }
 0x443   :  { %1060 = vst [vmem:[#allocation2] sm:$0x8] %v1059_v12  ;;  %v1062_v15 = vrot.slane %v1059_v12, 3  ;;  %v2961_v12 = vld [vmem:[#allocation9 + $0x28] sm:$0xff] }
 0x444   :  { %3370 = vst [vmem:[#allocation30_spill] sm:$0xff] %v2961_v12 }
 0x445   :  { %1129 = vmatmul.mubr.f32.vlgmr.msra.gmra.mxu0 %v1062_v15  ;;  %1200 = vmatmul.mubr.f32.vlgmr.msra.gmra.mxu1 %v1062_v15  ;;  %v2964_v15 = vld [vmem:[#allocation9 + $0x38] sm:$0xff] }
 0x446   :  { %1254 = vmatpush1.msra.mxu0 %v2799_v17  ;;  %1325 = vmatpush1.msra.mxu1 %v2802_v20  ;;  %3371 = vst [vmem:[#allocation31_spill] sm:$0xff] %v2964_v15 }
 0x447   :  { %1255 = vmatprep.subr.mxu0 %v2805_v9  ;;  %1326 = vmatprep.subr.mxu1 %v2808_v2 }
 0x448   :  { %1256 = vmatpush1.msra.mxu0 %v2811_v0  ;;  %1327 = vmatpush1.msra.mxu1 %v2814_v21 }
 0x449   :  { %1257 = vmatprep.subr.mxu0 %v2817_v22  ;;  %1328 = vmatprep.subr.mxu1 %v2820_v23 }
 0x44a   :  { %1258 = vmatpush1.msra.mxu0 %v2823_v24  ;;  %1329 = vmatpush1.msra.mxu1 %v2826_v25 }
 0x44b   :  { %1259 = vmatprep.subr.mxu0 %v2829_v26  ;;  %1330 = vmatprep.subr.mxu1 %v2832_v27 }
 0x44c   :  { %1260 = vmatpush1.msra.mxu0 %v2835_v28  ;;  %1331 = vmatpush1.msra.mxu1 %v2838_v29 }
 0x44d   :  { %1261 = vmatprep.subr.mxu0 %v2841_v30  ;;  %1332 = vmatprep.subr.mxu1 %v2844_v31 }
 0x44e   :  { %1262 = vmatpush1.msra.mxu0 %v2847_v32  ;;  %1333 = vmatpush1.msra.mxu1 %v2850_v33 }
 0x44f   :  { %1263 = vmatprep.subr.mxu0 %v2853_v34  ;;  %1334 = vmatprep.subr.mxu1 %v2856_v35 }
 0x450   :  { %1264 = vmatpush1.msra.mxu0 %v2859_v36  ;;  %1335 = vmatpush1.msra.mxu1 %v2862_v37 }
 0x451   :  { %1265 = vmatprep.subr.mxu0 %v2865_v38  ;;  %1336 = vmatprep.subr.mxu1 %v2868_v39 }
 0x452   :  { %1266 = vmatpush1.msra.mxu0 %v2871_v41  ;;  %1337 = vmatpush1.msra.mxu1 %v2874_v44 }
 0x453   :  { %1267 = vmatprep.subr.mxu0 %v2877_v45  ;;  %1338 = vmatprep.subr.mxu1 %v2880_v46 }
 0x454   :  { %1268 = vmatpush1.msra.mxu0 %v2883_v47  ;;  %1339 = vmatpush1.msra.mxu1 %v2886_v48 }
 0x455   :  { %1269 = vmatprep.subr.mxu0 %v2889_v49  ;;  %1340 = vmatprep.subr.mxu1 %v2892_v50 }
 0x456   :  { %1270 = vmatpush1.msra.mxu0 %v2895_v51  ;;  %1341 = vmatpush1.msra.mxu1 %v2898_v52 }
 0x457   :  { %1271 = vmatprep.subr.mxu0 %v2901_v53  ;;  %1342 = vmatprep.subr.mxu1 %v2904_v54 }
 0x458   :  { %1272 = vmatpush1.msra.mxu0 %v2907_v55  ;;  %1343 = vmatpush1.msra.mxu1 %v2910_v56 }
 0x459   :  { %1273 = vmatprep.subr.mxu0 %v2913_v57  ;;  %1344 = vmatprep.subr.mxu1 %v2916_v58 }
 0x45a   :  { %1274 = vmatpush1.msra.mxu0 %v2919_v59  ;;  %1345 = vmatpush1.msra.mxu1 %v2922_v60 }
 0x45b   :  { %1275 = vmatprep.subr.mxu0 %v2925_v61  ;;  %1346 = vmatprep.subr.mxu1 %v2928_v62 }
 0x45c   :  { %1276 = vmatpush1.msra.mxu0 %v2931_v3  ;;  %1347 = vmatpush1.msra.mxu1 %v2934_v6 }
 0x45d   :  { %1277 = vmatprep.subr.mxu0 %v2937_v4  ;;  %1348 = vmatprep.subr.mxu1 %v2940_v1 }
 0x45e   :  { %1278 = vmatpush1.msra.mxu0 %v2943_v16  ;;  %1349 = vmatpush1.msra.mxu1 %v2946_v13 }
 0x45f   :  { %1279 = vmatprep.subr.mxu0 %v2949_v5  ;;  %1350 = vmatprep.subr.mxu1 %v2952_v19  ;;  %v2967_v5 = vld [vmem:[#allocation9 + $0x20] sm:$0xff]  ;;  %v2970_v19 = vld [vmem:[#allocation9 + $0x30] sm:$0xff] }
 0x460   :  { %1280 = vmatpush1.msra.mxu0 %v2955_v14  ;;  %1351 = vmatpush1.msra.mxu1 %v2958_v10  ;;  %3372 = vst [vmem:[#allocation32_spill] sm:$0xff] %v2967_v5  ;;  %3373 = vst [vmem:[#allocation33_spill] sm:$0xff] %v2970_v19  ;;  %v2973_v14 = vld [vmem:[#allocation9 + $0x8] sm:$0xff]  ;;  %v2976_v10 = vld [vmem:[#allocation9 + $0x18] sm:$0xff] }
 0x461   :  { %1281 = vmatprep.subr.mxu0 %v2961_v12  ;;  %1352 = vmatprep.subr.mxu1 %v2964_v15  ;;  %3374 = vst [vmem:[#allocation34_spill] sm:$0xff] %v2973_v14  ;;  %3375 = vst [vmem:[#allocation35_spill] sm:$0xff] %v2976_v10  ;;  %v2979_v12 = vld [vmem:[#allocation9] sm:$0xff]  ;;  %v2983_v15 = vld [vmem:[#allocation9 + $0x10] sm:$0xff] }
 0x462   :  { %1282 = vmatpush1.msra.mxu0 %v2967_v5  ;;  %1353 = vmatpush1.msra.mxu1 %v2970_v19  ;;  %3376 = vst [vmem:[#allocation36_spill] sm:$0xff] %v2979_v12  ;;  %3377 = vst [vmem:[#allocation37_spill] sm:$0xff] %v2983_v15 }
 0x463   :  { %1283 = vmatprep.subr.mxu0 %v2973_v14  ;;  %1354 = vmatprep.subr.mxu1 %v2976_v10 }
 0x464   :  { %1284 = vmatpush1.msra.mxu0 %v2979_v12  ;;  %1317 = vmatprep.mubr.f32.mxu0 %v3354_v40 }
 0x465   :  { %1355 = vmatpush1.msra.mxu1 %v2983_v15  ;;  %1388 = vmatprep.mubr.f32.mxu1 %v3354_v40 }
 0x466   :  { %1442 = vmatprep.subr.mxu0 %v2785_v42  ;;  %1513 = vmatprep.subr.mxu1 %v2788_v43 }
 0x505   :  { %v1130_v14 = vpop.f32.mrf.mxu0  ;;  %v1201_v13 = vpop.f32.mrf.mxu1 }
 0x506   :  { %v1210_v19 = vrot.slane %v1130_v14, 4  ;;  %v1212_v42 = vrot.slane %v1201_v13, 4 }
 0x507   :  { %v1132_v5 = vpop.f32.mrf.mxu0  ;;  %v1203_v6 = vpop.f32.mrf.mxu1 }
 0x508   :  { %v1218_v10 = vadd.f32 %v1210_v19, %v3311_v63  ;;  %v1211_v16 = vrot.slane %v1132_v5, 4  ;;  %v1213_v15 = vrot.slane %v1203_v6, 4  ;;  %v1220_v14 = vadd.f32 %v1212_v42, %v2564_v11 }
 0x50a   :  { %v1888_v12 = vmul.f32 -1.442695, %v1218_v10  ;;  %v1219_v1 = vadd.f32 %v1211_v16, %v2557_v8  ;;  %v1221_v40 = vadd.f32 %v1213_v15, %v2561_v18  ;;  %v3380_v15 = vld [vmem:[#allocation20_spill] sm:$0xff] }
 0x50c   :  { %1974 = vpow2.f32 %v1888_v12  ;;  %v1889_v4 = vmul.f32 -1.442695, %v1219_v1  ;;  %v1890_v3 = vmul.f32 -1.442695, %v1221_v40 }
 0x50e   :  { %1976 = vpow2.f32 %v1889_v4  ;;  %v1242_v4 = vrot.slane %v2796_v7, 7  ;;  %v3378_v7 = vld [vmem:[#allocation18_spill] sm:$0xff] }
 0x50f   :  { %1978 = vpow2.f32 %v1890_v3  ;;  %v3379_v3 = vld [vmem:[#allocation19_spill] sm:$0xff] }
 0x519   :  { %v1975_v43 = vpop.eup %1974 }
 0x51a   :  { %v1225_v62 = vadd.f32 1.0, %v1975_v43 }
 0x51b   :  { %v1977_v61 = vpop.eup %1976 }
 0x51c   :  { %1980 = vrcp.f32 %v1225_v62  ;;  %v1231_v5 = vadd.f32 1.0, %v1977_v61  ;;  %v1979_v16 = vpop.eup %1978 }
 0x51d   :  { %1982 = vtanh.f32 %v1220_v14  ;;  %v1238_v10 = vadd.f32 1.0, %v1979_v16  ;;  %v3381_v14 = vld [vmem:[#allocation21_spill] sm:$0xff]  ;;  %v3383_v16 = vld [vmem:[#allocation23_spill] sm:$0xff] }
 0x51e   :  { %1984 = vrcp.f32 %v1231_v5  ;;  %v3382_v5 = vld [vmem:[#allocation22_spill] sm:$0xff] }
 0x51f   :  { %1986 = vrcp.f32 %v1238_v10  ;;  %v3388_v10 = vld [vmem:[#allocation28_spill] sm:$0xff] }
 0x529   :  { %v1981_v19 = vpop.eup %1980 }
 0x52a   :  { %v1983_v1 = vpop.eup %1982 }
 0x52b   :  { %v1985_v6 = vpop.eup %1984  ;;  %v1245_v12 = vmul.f32 %v1983_v1, %v1981_v19  ;;  %v3384_v19 = vld [vmem:[#allocation24_spill] sm:$0xff]  ;;  %v3385_v1 = vld [vmem:[#allocation25_spill] sm:$0xff] }
 0x52c   :  { %v1244_v13 = vmul.f32 %v1985_v6, %v1242_v4  ;;  %v1987_v42 = vpop.eup %1986  ;;  %v3386_v4 = vld [vmem:[#allocation26_spill] sm:$0xff]  ;;  %v3387_v6 = vld [vmem:[#allocation27_spill] sm:$0xff] }
 0x52e   :  { %v2994_v40 = vadd.f32 %v1245_v12, %v1244_v13  ;;  %v3389_v12 = vld [vmem:[#allocation29_spill] sm:$0xff]  ;;  %v3390_v13 = vld [vmem:[#allocation30_spill] sm:$0xff] }
 0x530   :  { %1988 = vtanh.f32 %v2994_v40 }
 0x53d   :  { %v1989_v43 = vpop.eup %1988 }
 0x53e   :  { %v1248_v62 = vmul.f32 %v1989_v43, %v1987_v42  ;;  %v3391_v42 = vld [vmem:[#allocation31_spill] sm:$0xff]  ;;  %v3392_v43 = vld [vmem:[#allocation32_spill] sm:$0xff] }
 0x540   :  { %1249 = vst [vmem:[#allocation2] sm:$0x10] %v1248_v62  ;;  %v1251_v61 = vrot.slane %v1248_v62, 4  ;;  %v3393_v62 = vld [vmem:[#allocation33_spill] sm:$0xff] }
 0x542   :  { %1318 = vmatmul.mubr.f32.vlgmr.msra.gmra.mxu0 %v1251_v61  ;;  %1389 = vmatmul.mubr.f32.vlgmr.msra.gmra.mxu1 %v1251_v61  ;;  %v3394_v61 = vld [vmem:[#allocation34_spill] sm:$0xff] }
 0x543   :  { %1443 = vmatpush1.msra.mxu0 %v2799_v17  ;;  %1514 = vmatpush1.msra.mxu1 %v2802_v20 }
 0x544   :  { %1444 = vmatprep.subr.mxu0 %v2805_v9  ;;  %1515 = vmatprep.subr.mxu1 %v2808_v2 }
 0x545   :  { %1445 = vmatpush1.msra.mxu0 %v2811_v0  ;;  %1516 = vmatpush1.msra.mxu1 %v2814_v21 }
 0x546   :  { %1446 = vmatprep.subr.mxu0 %v2817_v22  ;;  %1517 = vmatprep.subr.mxu1 %v2820_v23 }
 0x547   :  { %1447 = vmatpush1.msra.mxu0 %v2823_v24  ;;  %1518 = vmatpush1.msra.mxu1 %v2826_v25 }
 0x548   :  { %1448 = vmatprep.subr.mxu0 %v2829_v26  ;;  %1519 = vmatprep.subr.mxu1 %v2832_v27 }
 0x549   :  { %1449 = vmatpush1.msra.mxu0 %v2835_v28  ;;  %1520 = vmatpush1.msra.mxu1 %v2838_v29 }
 0x54a   :  { %1450 = vmatprep.subr.mxu0 %v2841_v30  ;;  %1521 = vmatprep.subr.mxu1 %v2844_v31 }
 0x54b   :  { %1451 = vmatpush1.msra.mxu0 %v2847_v32  ;;  %1522 = vmatpush1.msra.mxu1 %v2850_v33 }
 0x54c   :  { %1452 = vmatprep.subr.mxu0 %v2853_v34  ;;  %1523 = vmatprep.subr.mxu1 %v2856_v35 }
 0x54d   :  { %1453 = vmatpush1.msra.mxu0 %v2859_v36  ;;  %1524 = vmatpush1.msra.mxu1 %v2862_v37 }
 0x54e   :  { %1454 = vmatprep.subr.mxu0 %v2865_v38  ;;  %1525 = vmatprep.subr.mxu1 %v2868_v39 }
 0x54f   :  { %1455 = vmatpush1.msra.mxu0 %v2871_v41  ;;  %1526 = vmatpush1.msra.mxu1 %v2874_v44 }
 0x550   :  { %1456 = vmatprep.subr.mxu0 %v2877_v45  ;;  %1527 = vmatprep.subr.mxu1 %v2880_v46 }
 0x551   :  { %1457 = vmatpush1.msra.mxu0 %v2883_v47  ;;  %1528 = vmatpush1.msra.mxu1 %v2886_v48 }
 0x552   :  { %1458 = vmatprep.subr.mxu0 %v2889_v49  ;;  %1529 = vmatprep.subr.mxu1 %v2892_v50 }
 0x553   :  { %1459 = vmatpush1.msra.mxu0 %v2895_v51  ;;  %1530 = vmatpush1.msra.mxu1 %v2898_v52 }
 0x554   :  { %1460 = vmatprep.subr.mxu0 %v2901_v53  ;;  %1531 = vmatprep.subr.mxu1 %v2904_v54 }
 0x555   :  { %1461 = vmatpush1.msra.mxu0 %v2907_v55  ;;  %1532 = vmatpush1.msra.mxu1 %v2910_v56 }
 0x556   :  { %1462 = vmatprep.subr.mxu0 %v2913_v57  ;;  %1533 = vmatprep.subr.mxu1 %v2916_v58 }
 0x557   :  { %1463 = vmatpush1.msra.mxu0 %v2919_v59  ;;  %1534 = vmatpush1.msra.mxu1 %v2922_v60 }
 0x558   :  { %1464 = vmatprep.subr.mxu0 %v3378_v7  ;;  %1535 = vmatprep.subr.mxu1 %v3379_v3 }
 0x559   :  { %1465 = vmatpush1.msra.mxu0 %v3380_v15  ;;  %1536 = vmatpush1.msra.mxu1 %v3381_v14 }
 0x55a   :  { %1466 = vmatprep.subr.mxu0 %v3382_v5  ;;  %1537 = vmatprep.subr.mxu1 %v3383_v16 }
 0x55b   :  { %1467 = vmatpush1.msra.mxu0 %v3384_v19  ;;  %1538 = vmatpush1.msra.mxu1 %v3385_v1  ;;  %v3395_v19 = vld [vmem:[#allocation35_spill] sm:$0xff]  ;;  %v3396_v1 = vld [vmem:[#allocation36_spill] sm:$0xff] }
 0x55c   :  { %1468 = vmatprep.subr.mxu0 %v3386_v4  ;;  %1539 = vmatprep.subr.mxu1 %v3387_v6  ;;  %v3397_v4 = vmov 0.0   ;;  %v3398_v6 = vld [vmem:[#allocation37_spill] sm:$0xff] }
 0x55d   :  { %1469 = vmatpush1.msra.mxu0 %v3388_v10  ;;  %1540 = vmatpush1.msra.mxu1 %v3389_v12  ;;  %v3399_v12 = vld [vmem:[#allocation39_spill] sm:$0xff] }
 0x55e   :  { %1470 = vmatprep.subr.mxu0 %v3390_v13  ;;  %1541 = vmatprep.subr.mxu1 %v3391_v42  ;;  %v3400_v13 = vld [vmem:[#allocation17_spill] sm:$0xff] }
 0x55f   :  { %1471 = vmatpush1.msra.mxu0 %v3392_v43  ;;  %1542 = vmatpush1.msra.mxu1 %v3393_v62 }
 0x560   :  { %1472 = vmatprep.subr.mxu0 %v3394_v61  ;;  %1543 = vmatprep.subr.mxu1 %v3395_v19 }
 0x561   :  { %1473 = vmatpush1.msra.mxu0 %v3396_v1  ;;  %1506 = vmatprep.mubr.f32.mxu0 %v3397_v4 }
 0x562   :  { %1544 = vmatpush1.msra.mxu1 %v3398_v6  ;;  %1577 = vmatprep.mubr.f32.mxu1 %v3397_v4 }
 0x563   :  { %1631 = vmatprep.subr.mxu0 %v3399_v12  ;;  %1702 = vmatprep.subr.mxu1 %v3400_v13 }
 0x602   :  { %v1319_v42 = vpop.f32.mrf.mxu0  ;;  %v1390_v61 = vpop.f32.mrf.mxu1 }
 0x603   :  { %v1399_v43 = vrot.slane %v1319_v42, 3  ;;  %v1401_v12 = vrot.slane %v1390_v61, 3 }
 0x604   :  { %v1321_v10 = vpop.f32.mrf.mxu0  ;;  %v1392_v14 = vpop.f32.mrf.mxu1 }
 0x605   :  { %v1407_v62 = vadd.f32 %v1399_v43, %v3311_v63  ;;  %v1400_v16 = vrot.slane %v1321_v10, 3  ;;  %v1402_v6 = vrot.slane %v1392_v14, 3  ;;  %v1409_v42 = vadd.f32 %v1401_v12, %v2564_v11 }
 0x607   :  { %v1891_v19 = vmul.f32 -1.442695, %v1407_v62  ;;  %v1408_v1 = vadd.f32 %v1400_v16, %v2557_v8  ;;  %v1410_v4 = vadd.f32 %v1402_v6, %v2561_v18 }
 0x609   :  { %1990 = vpow2.f32 %v1891_v19  ;;  %v1892_v5 = vmul.f32 -1.442695, %v1408_v1  ;;  %v1893_v15 = vmul.f32 -1.442695, %v1410_v4 }
 0x60b   :  { %1992 = vpow2.f32 %v1892_v5  ;;  %v1431_v5 = vrot.slane %v2994_v40, 7 }
 0x60c   :  { %1994 = vpow2.f32 %v1893_v15 }
 0x616   :  { %v1991_v13 = vpop.eup %1990 }
 0x617   :  { %v1414_v3 = vadd.f32 1.0, %v1991_v13 }
 0x618   :  { %v1993_v7 = vpop.eup %1992 }
 0x619   :  { %1996 = vrcp.f32 %v1414_v3  ;;  %v1420_v10 = vadd.f32 1.0, %v1993_v7  ;;  %v1995_v16 = vpop.eup %1994 }
 0x61a   :  { %1998 = vtanh.f32 %v1409_v42  ;;  %v1427_v43 = vadd.f32 1.0, %v1995_v16 }
 0x61b   :  { %2000 = vrcp.f32 %v1420_v10 }
 0x61c   :  { %2002 = vrcp.f32 %v1427_v43 }
 0x626   :  { %v1997_v19 = vpop.eup %1996 }
 0x627   :  { %v1999_v1 = vpop.eup %1998 }
 0x628   :  { %v2001_v14 = vpop.eup %2000  ;;  %v1434_v6 = vmul.f32 %v1999_v1, %v1997_v19 }
 0x629   :  { %v1433_v62 = vmul.f32 %v2001_v14, %v1431_v5  ;;  %v2003_v61 = vpop.eup %2002 }
 0x62b   :  { %v3068_v4 = vadd.f32 %v1434_v6, %v1433_v62 }
 0x62d   :  { %2004 = vtanh.f32 %v3068_v4  ;;  %v1620_v12 = vrot.slane %v3068_v4, 7 }
 0x63a   :  { %v2005_v15 = vpop.eup %2004 }
 0x63b   :  { %v1437_v3 = vmul.f32 %v2005_v15, %v2003_v61 }
 0x63d   :  { %1438 = vst [vmem:[#allocation2] sm:$0x20] %v1437_v3  ;;  %v1440_v7 = vrot.slane %v1437_v3, 5 }
 0x63f   :  { %1507 = vmatmul.mubr.f32.vlgmr.msra.gmra.mxu0 %v1440_v7  ;;  %1578 = vmatmul.mubr.f32.vlgmr.msra.gmra.mxu1 %v1440_v7 }
 0x640   :  { %1632 = vmatpush1.msra.mxu0 %v2799_v17  ;;  %1703 = vmatpush1.msra.mxu1 %v2802_v20  ;;  %v3401_v17 = vld [vmem:[#allocation18_spill] sm:$0xff]  ;;  %v3402_v20 = vld [vmem:[#allocation19_spill] sm:$0xff] }
 0x641   :  { %1633 = vmatprep.subr.mxu0 %v2805_v9  ;;  %1704 = vmatprep.subr.mxu1 %v2808_v2  ;;  %v3403_v9 = vld [vmem:[#allocation20_spill] sm:$0xff]  ;;  %v3404_v2 = vld [vmem:[#allocation21_spill] sm:$0xff] }
 0x642   :  { %1634 = vmatpush1.msra.mxu0 %v2811_v0  ;;  %1705 = vmatpush1.msra.mxu1 %v2814_v21  ;;  %v3405_v0 = vld [vmem:[#allocation22_spill] sm:$0xff]  ;;  %v3406_v21 = vld [vmem:[#allocation23_spill] sm:$0xff] }
 0x643   :  { %1635 = vmatprep.subr.mxu0 %v2817_v22  ;;  %1706 = vmatprep.subr.mxu1 %v2820_v23  ;;  %v3407_v22 = vld [vmem:[#allocation24_spill] sm:$0xff]  ;;  %v3408_v23 = vld [vmem:[#allocation25_spill] sm:$0xff] }
 0x644   :  { %1636 = vmatpush1.msra.mxu0 %v2823_v24  ;;  %1707 = vmatpush1.msra.mxu1 %v2826_v25  ;;  %v3409_v24 = vld [vmem:[#allocation26_spill] sm:$0xff]  ;;  %v3410_v25 = vld [vmem:[#allocation27_spill] sm:$0xff] }
 0x645   :  { %1637 = vmatprep.subr.mxu0 %v2829_v26  ;;  %1708 = vmatprep.subr.mxu1 %v2832_v27  ;;  %v3411_v26 = vld [vmem:[#allocation28_spill] sm:$0xff]  ;;  %v3412_v27 = vld [vmem:[#allocation29_spill] sm:$0xff] }
 0x646   :  { %1638 = vmatpush1.msra.mxu0 %v2835_v28  ;;  %1709 = vmatpush1.msra.mxu1 %v2838_v29  ;;  %v3413_v28 = vld [vmem:[#allocation30_spill] sm:$0xff]  ;;  %v3414_v29 = vld [vmem:[#allocation31_spill] sm:$0xff] }
 0x647   :  { %1639 = vmatprep.subr.mxu0 %v2841_v30  ;;  %1710 = vmatprep.subr.mxu1 %v2844_v31  ;;  %v3415_v30 = vld [vmem:[#allocation32_spill] sm:$0xff]  ;;  %v3416_v31 = vld [vmem:[#allocation33_spill] sm:$0xff] }
 0x648   :  { %1640 = vmatpush1.msra.mxu0 %v2847_v32  ;;  %1711 = vmatpush1.msra.mxu1 %v2850_v33  ;;  %v3417_v32 = vld [vmem:[#allocation34_spill] sm:$0xff]  ;;  %v3418_v33 = vld [vmem:[#allocation35_spill] sm:$0xff] }
 0x649   :  { %1641 = vmatprep.subr.mxu0 %v2853_v34  ;;  %1712 = vmatprep.subr.mxu1 %v2856_v35  ;;  %v3419_v34 = vld [vmem:[#allocation36_spill] sm:$0xff]  ;;  %v3420_v35 = vmov 0.0  }
 0x64a   :  { %1642 = vmatpush1.msra.mxu0 %v2859_v36  ;;  %1713 = vmatpush1.msra.mxu1 %v2862_v37  ;;  %v3421_v36 = vld [vmem:[#allocation37_spill] sm:$0xff] }
 0x64b   :  { %1643 = vmatprep.subr.mxu0 %v2865_v38  ;;  %1714 = vmatprep.subr.mxu1 %v2868_v39 }
 0x64c   :  { %1644 = vmatpush1.msra.mxu0 %v2871_v41  ;;  %1715 = vmatpush1.msra.mxu1 %v2874_v44 }
 0x64d   :  { %1645 = vmatprep.subr.mxu0 %v2877_v45  ;;  %1716 = vmatprep.subr.mxu1 %v2880_v46 }
 0x64e   :  { %1646 = vmatpush1.msra.mxu0 %v2883_v47  ;;  %1717 = vmatpush1.msra.mxu1 %v2886_v48 }
 0x64f   :  { %1647 = vmatprep.subr.mxu0 %v2889_v49  ;;  %1718 = vmatprep.subr.mxu1 %v2892_v50 }
 0x650   :  { %1648 = vmatpush1.msra.mxu0 %v2895_v51  ;;  %1719 = vmatpush1.msra.mxu1 %v2898_v52 }
 0x651   :  { %1649 = vmatprep.subr.mxu0 %v2901_v53  ;;  %1720 = vmatprep.subr.mxu1 %v2904_v54 }
 0x652   :  { %1650 = vmatpush1.msra.mxu0 %v2907_v55  ;;  %1721 = vmatpush1.msra.mxu1 %v2910_v56 }
 0x653   :  { %1651 = vmatprep.subr.mxu0 %v2913_v57  ;;  %1722 = vmatprep.subr.mxu1 %v2916_v58 }
 0x654   :  { %1652 = vmatpush1.msra.mxu0 %v2919_v59  ;;  %1723 = vmatpush1.msra.mxu1 %v2922_v60 }
 0x655   :  { %1653 = vmatprep.subr.mxu0 %v3401_v17  ;;  %1724 = vmatprep.subr.mxu1 %v3402_v20 }
 0x656   :  { %1654 = vmatpush1.msra.mxu0 %v3403_v9  ;;  %1725 = vmatpush1.msra.mxu1 %v3404_v2 }
 0x657   :  { %1655 = vmatprep.subr.mxu0 %v3405_v0  ;;  %1726 = vmatprep.subr.mxu1 %v3406_v21 }
 0x658   :  { %1656 = vmatpush1.msra.mxu0 %v3407_v22  ;;  %1727 = vmatpush1.msra.mxu1 %v3408_v23 }
 0x659   :  { %1657 = vmatprep.subr.mxu0 %v3409_v24  ;;  %1728 = vmatprep.subr.mxu1 %v3410_v25 }
 0x65a   :  { %1658 = vmatpush1.msra.mxu0 %v3411_v26  ;;  %1729 = vmatpush1.msra.mxu1 %v3412_v27 }
 0x65b   :  { %1659 = vmatprep.subr.mxu0 %v3413_v28  ;;  %1730 = vmatprep.subr.mxu1 %v3414_v29 }
 0x65c   :  { %1660 = vmatpush1.msra.mxu0 %v3415_v30  ;;  %1731 = vmatpush1.msra.mxu1 %v3416_v31 }
 0x65d   :  { %1661 = vmatprep.subr.mxu0 %v3417_v32  ;;  %1732 = vmatprep.subr.mxu1 %v3418_v33 }
 0x65e   :  { %1662 = vmatpush1.msra.mxu0 %v3419_v34  ;;  %1695 = vmatprep.mubr.f32.mxu0 %v3420_v35 }
 0x65f   :  { %1733 = vmatpush1.msra.mxu1 %v3421_v36  ;;  %1766 = vmatprep.mubr.f32.mxu1 %v3420_v35  ;;  %v1900_v36 = vld [vmem:[%s3162_s6] ss:$0 sm:$0xff] }
 0x6ff   :  { %v1508_v37 = vpop.f32.mrf.mxu0  ;;  %v1579_v44 = vpop.f32.mrf.mxu1 }
 0x700   :  { %v1588_v38 = vrot.slane %v1508_v37, 2  ;;  %v1590_v52 = vrot.slane %v1579_v44, 2 }
 0x701   :  { %v1510_v39 = vpop.f32.mrf.mxu0  ;;  %v1581_v49 = vpop.f32.mrf.mxu1 }
 0x702   :  { %v1596_v41 = vadd.f32 %v1588_v38, %v3311_v63  ;;  %v1589_v45 = vrot.slane %v1510_v39, 2  ;;  %v1591_v50 = vrot.slane %v1581_v49, 2  ;;  %v1598_v55 = vadd.f32 %v1590_v52, %v2564_v11 }
 0x704   :  { %v1894_v46 = vmul.f32 -1.442695, %v1596_v41  ;;  %v1597_v47 = vadd.f32 %v1589_v45, %v2557_v8  ;;  %v1599_v51 = vadd.f32 %v1591_v50, %v2561_v18 }
 0x706   :  { %2006 = vpow2.f32 %v1894_v46  ;;  %v1895_v48 = vmul.f32 -1.442695, %v1597_v47  ;;  %v1896_v53 = vmul.f32 -1.442695, %v1599_v51 }
 0x708   :  { %2008 = vpow2.f32 %v1895_v48 }
 0x709   :  { %2010 = vpow2.f32 %v1896_v53 }
 0x713   :  { %v2007_v54 = vpop.eup %2006 }
 0x714   :  { %v1603_v56 = vadd.f32 1.0, %v2007_v54 }
 0x715   :  { %v2009_v57 = vpop.eup %2008 }
 0x716   :  { %2012 = vrcp.f32 %v1603_v56  ;;  %v1609_v58 = vadd.f32 1.0, %v2009_v57  ;;  %v2011_v59 = vpop.eup %2010 }
 0x717   :  { %2014 = vtanh.f32 %v1598_v55  ;;  %v1616_v42 = vadd.f32 1.0, %v2011_v59 }
 0x718   :  { %2016 = vrcp.f32 %v1609_v58 }
 0x719   :  { %2018 = vrcp.f32 %v1616_v42 }
 0x723   :  { %v2013_v60 = vpop.eup %2012 }
 0x724   :  { %v2015_v40 = vpop.eup %2014 }
 0x725   :  { %v2017_v13 = vpop.eup %2016  ;;  %v1623_v10 = vmul.f32 %v2015_v40, %v2013_v60 }
 0x726   :  { %v1622_v16 = vmul.f32 %v2017_v13, %v1620_v12  ;;  %v2019_v1 = vpop.eup %2018 }
 0x728   :  { %v1624_v19 = vadd.f32 %v1623_v10, %v1622_v16 }
 0x72a   :  { %2020 = vtanh.f32 %v1624_v19  ;;  %v1809_v29 = vrot.slane %v1624_v19, 7 }
 0x737   :  { %v2021_v5 = vpop.eup %2020 }
 0x738   :  { %v1626_v14 = vmul.f32 %v2021_v5, %v2019_v1 }
 0x73a   :  { %1627 = vst [vmem:[#allocation2] sm:$0x40] %v1626_v14  ;;  %v1629_v43 = vrot.slane %v1626_v14, 6 }
 0x73c   :  { %1696 = vmatmul.mubr.f32.vlgmr.msra.gmra.mxu0 %v1629_v43  ;;  %1767 = vmatmul.mubr.f32.vlgmr.msra.gmra.mxu1 %v1629_v43 }
 0x7fc   :  { %v1697_v6 = vpop.f32.mrf.mxu0  ;;  %v1768_v4 = vpop.f32.mrf.mxu1 }
 0x7fd   :  { %v1777_v62 = vrot.slane %v1697_v6, 1  ;;  %v1779_v21 = vrot.slane %v1768_v4, 1 }
 0x7fe   :  { %v1699_v61 = vpop.f32.mrf.mxu0  ;;  %v1770_v9 = vpop.f32.mrf.mxu1 }
 0x7ff   :  { %v1785_v15 = vadd.f32 %v1777_v62, %v3311_v63  ;;  %v1778_v3 = vrot.slane %v1699_v61, 1  ;;  %v1780_v2 = vrot.slane %v1770_v9, 1  ;;  %v1787_v24 = vadd.f32 %v1779_v21, %v2564_v11 }
 0x801   :  { %v1897_v7 = vmul.f32 -1.442695, %v1785_v15  ;;  %v1786_v17 = vadd.f32 %v1778_v3, %v2557_v8  ;;  %v1788_v0 = vadd.f32 %v1780_v2, %v2561_v18 }
 0x803   :  { %2022 = vpow2.f32 %v1897_v7  ;;  %v1898_v20 = vmul.f32 -1.442695, %v1786_v17  ;;  %v1899_v22 = vmul.f32 -1.442695, %v1788_v0 }
 0x805   :  { %2024 = vpow2.f32 %v1898_v20 }
 0x806   :  { %2026 = vpow2.f32 %v1899_v22 }
 0x810   :  { %v2023_v23 = vpop.eup %2022 }
 0x811   :  { %v1792_v25 = vadd.f32 1.0, %v2023_v23 }
 0x812   :  { %v2025_v26 = vpop.eup %2024 }
 0x813   :  { %2028 = vrcp.f32 %v1792_v25  ;;  %v1798_v63 = vadd.f32 1.0, %v2025_v26  ;;  %v2027_v8 = vpop.eup %2026 }
 0x814   :  { %2030 = vtanh.f32 %v1787_v24  ;;  %v1805_v31 = vadd.f32 1.0, %v2027_v8 }
 0x815   :  { %2032 = vrcp.f32 %v1798_v63 }
 0x816   :  { %2034 = vrcp.f32 %v1805_v31 }
 0x820   :  { %v2029_v27 = vpop.eup %2028 }
 0x821   :  { %v2031_v28 = vpop.eup %2030 }
 0x822   :  { %v2033_v30 = vpop.eup %2032  ;;  %v1812_v32 = vmul.f32 %v2031_v28, %v2029_v27 }
 0x823   :  { %v1811_v18 = vmul.f32 %v2033_v30, %v1809_v29  ;;  %v2035_v11 = vpop.eup %2034 }
 0x825   :  { %v1813_v33 = vadd.f32 %v1812_v32, %v1811_v18 }
 0x827   :  { %2036 = vtanh.f32 %v1813_v33  ;;  %1818 = vst [vmem:[#allocation11 - $0x7] sm:$0x80] %v1813_v33 }
 0x834   :  { %v2037_v34 = vpop.eup %2036 }
 0x835   :  { %v1815_v35 = vmul.f32 %v2037_v34, %v2035_v11 }
 0x837   :  { %1816 = vst [vmem:[#allocation2] sm:$0x80] %v1815_v35  ;;  %1817 = vst [vmem:[#allocation10 - $0x7] sm:$0x80] %v1815_v35 }
 0x83e   :  { %v1819_v37 = vld [vmem:[#allocation2] sm:$0xff] }
 0x83f   :  { %v1827_v38 = vmul.f32 %v1900_v36, %v1819_v37 }
 0x841   :  { %1828 = vadd.xlane.f32.xlu0 %v1827_v38 }
 0x842   :  { %2173 = shalt.err (!%p2170_p5)
}
 0x843   :  { %1851 = dma.vmem_to_hbm [thread:$0]  %s1849_s14, 16, %s3165_s9, [#allocation6]  }
 0x844   :  { %s2182_s6 = scalar_lea.vmem %s1859_s16, 16  ;;  %s2186_s21 = scalar_lea.vmem %s1859_s16, 32 }
 0x845   :  { %p2183_p6 = scmp.ne.s32.totalorder %s1859_s16, %s2182_s6  ;;  %p2187_p7 = scmp.lt.s32.totalorder %s1859_s16, %s1859_s16 }
 0x846   :  { %p2188_p8 = scmp.lt.s32.totalorder %s2186_s21, %s2182_s6 }
 0x848   :  { %p2189_p9 = por %p2188_p8, %p2187_p7 }
 0x84a   :  { %p2190_p10 = pnand %p2189_p9, %p2183_p6 }
 0x84c   :  { %2193 = shalt.err (!%p2190_p10)
}
 0x84d   :  { %1861 = dma.vmem_to_hbm [thread:$0]  %s1859_s16, 16, %s3166_s10, [#allocation12]   ;;  %v1901_v39 = vld [vmem:[#allocation3] ss:$0 sm:$0xff]  ;;  %vm1838_vm1 = vcmask 7168  }
 0x8ca   :  { %v1829_v41 = vpop.xlane.xlu0 %1828 }
 0x8cb   :  { %v1837_v44 = vadd.f32 %v1901_v39, %v1829_v41 }
 0x8cd   :  { %1839 = vst.msk [vmem:[%s3164_s8] sm:$0xff] %vm1838_vm1, %v1837_v44 }
 0x8ce   :  { %2206 = dma.done.wait [#allocation6], 16  }
 0x8cf   :  { %2207 = vsyncadd [#allocation6], 4294967280 }
 0x8d0   :  { %2208 = dma.done.wait [#allocation12], 16  }
 0x8d1   :  { %2209 = vsyncadd [#allocation12], 4294967280 }
 0x8d2   :  { %1870 = vsyncpa [#allocation5], 1 }
 0x8d3   :  { %1871 = vsyncpa [#allocation8], 1 }
 0x8d4   :  { %1872 = vsyncpa [#allocation6], 1 }
 0x8d5   :  { %1873 = vsyncpa [#allocation12], 1 }

</bundles_post_ra>
